<compile_context>
chip_gen: v7x
topology: tpu7x:2x2x1
jax: 0.10.0
libtpu: 0.0.40
codegen_flags: <defaults>
</compile_context>

<pallas_src>
import functools

import jax
import jax.numpy as jnp
from jax.experimental import pallas as pl
from jax.experimental.pallas import tpu as pltpu

_EPS = 1e-5


def _round_up(x, m):
    return ((x + m - 1) // m) * m


def _vmem_limit_bytes():
    """Per-generation VMEM budget: ~100 MiB on v5e/v6e, ~48 MiB on v7x."""
    try:
        cap = int(pltpu.get_tpu_info().vmem_capacity_bytes)
    except Exception:
        cap = 64 * 1024 * 1024                       # conservative default
    if cap >= 96 * 1024 * 1024:
        return 100 * 1024 * 1024                     # v5e / v6e (128 MiB physical)
    return max(cap - 16 * 1024 * 1024, (3 * cap) // 4)   # v7x: 64 -> 48 MiB


def _max_tile_rows(vmem_limit, fp, hp):
    """Largest batch tile (rows) whose pass-2 working set fits the VMEM budget."""
    stream = 2 * (2 * fp + 4 * fp + 4 * fp)   # dbl-buffered shared(bf16)+task(f32)+out(f32)
    scratch = 4 * (2 * hp + 3 * fp)           # h / r / logits / attn intermediates (rough)
    fixed = 2 * 2 * 2 * fp * hp               # w1 + w2, bf16, double-buffered
    budget = (vmem_limit * 3) // 5 - fixed    # ~60% of the limit; rest = compiler slack
    rows = max(budget // (stream + scratch), 8)
    return int(min(rows, 2048))


def _pick_tile_b(batch, cap_rows):
    """Largest multiple-of-8 divisor of `batch` <= cap_rows, preferring >= 2 tiles."""
    if batch % 8 != 0:
        # TODO(synk): pad ragged batches instead of running them as one block.
        return batch
    cap = max(8, min(batch, cap_rows))
    t = (cap // 8) * 8
    while t >= 8 and batch % t != 0:
        t -= 8
    if t < 8:
        t = batch
    if t == batch and batch >= 16 and (batch // 2) % 8 == 0:
        t = batch // 2   # >= 2 grid steps so "parallel" can use both v7x TensorCores
    return t


def _pad_cast(x, rows, cols, dtype):
    """Pad to (rows, cols) and cast — both skipped when already dense / right dtype."""
    if x.shape != (rows, cols):
        x = jnp.pad(x, ((0, rows - x.shape[0]), (0, cols - x.shape[1])))
    return x if x.dtype == dtype else x.astype(dtype)


# ---------------- pass 1: per-tile BatchNorm statistics of h = shared @ w1 ----------------

def _stats_kernel(shared_ref, w1_ref, psum_ref, psumsq_ref):
    # (tb, Fp) bf16 @ (Fp, Hp) bf16 -> f32 on the MXU.
    h = jnp.dot(shared_ref[...], w1_ref[...], preferred_element_type=jnp.float32)
    # Per-tile partial statistics, broadcast across the 8 sublanes of the output
    # block so the store is a full (8, 128)-aligned tile (finalize divides by 8*B).
    # One-pass sum / sum-of-squares is fine for roughly standardized activations;
    # switch to a two-pass / Welford variant if |mean| >> std.
    psum_ref[...] = jnp.broadcast_to(jnp.sum(h, axis=0, keepdims=True), psum_ref.shape)
    psumsq_ref[...] = jnp.broadcast_to(jnp.sum(h * h, axis=0, keepdims=True), psumsq_ref.shape)


# -------- pass 2: recompute h, fused BN finalize + ReLU + matmul + sigmoid + gate --------

def _gate_kernel(shared_ref, task_ref, w1_ref, psum_ref, psumsq_ref,
                 gamma_ref, beta_ref, w2_ref, b2_ref, out_ref, *, inv_n, eps):
    s_bf = shared_ref[...]                                           # (tb, Fp) bf16
    # Recompute h instead of round-tripping it through HBM (MXU slack is free).
    h = jnp.dot(s_bf, w1_ref[...], preferred_element_type=jnp.float32)

    # Fold full-batch (training-mode) BatchNorm into a single (1, Hp) scale/shift.
    mean = jnp.sum(psum_ref[...], axis=0, keepdims=True) * inv_n
    ex2 = jnp.sum(psumsq_ref[...], axis=0, keepdims=True) * inv_n
    var = jnp.maximum(ex2 - mean * mean, 0.0)                        # biased variance
    scale = gamma_ref[...] * jax.lax.rsqrt(var + eps)
    shift = beta_ref[...] - mean * scale

    r = jnp.maximum(h * scale + shift, 0.0)
    logits = jnp.dot(r.astype(jnp.bfloat16), w2_ref[...],
                     preferred_element_type=jnp.float32) + b2_ref[...]
    attn = jax.nn.sigmoid(logits)
    task = task_ref[...]
    out_ref[...] = task + attn * (s_bf.astype(jnp.float32) - task)


def attention_gating(shared, task, w1, b1, gamma, beta, w2, b2):
    """Forward pass of AttentionGatingModule (training-mode BatchNorm1d)."""
    # TODO(synk): the PyTorch dim-mismatch branch (F.linear with an eye() of the
    # *shared* dim) is ill-formed / dead in the original module; only equal
    # feature dims are supported here.
    del b1  # exactly absorbed by BatchNorm's batch-mean subtraction

    B, F = shared.shape
    H = w1.shape[1]
    Fp = _round_up(F, 128)
    Hp = _round_up(H, 128)
    f32, bf16 = jnp.float32, jnp.bfloat16

    # Big streamed operands in bf16; task/out stay f32 so they can alias.
    shared_bf = _pad_cast(shared, B, Fp, bf16)
    task_f = _pad_cast(task, B, Fp, f32)
    w1_bf = _pad_cast(w1, Fp, Hp, bf16)
    w2_bf = _pad_cast(w2, Hp, Fp, bf16)
    gamma_f = _pad_cast(gamma, 1, Hp, f32)
    beta_f = _pad_cast(beta, 1, Hp, f32)
    b2_f = _pad_cast(b2, 1, Fp, f32)

    vmem_limit = _vmem_limit_bytes()
    tb = _pick_tile_b(B, _max_tile_rows(vmem_limit, Fp, Hp))
    ntiles = max(B // tb, 1)
    grid = (ntiles,)
    cparams = pltpu.CompilerParams(
        dimension_semantics=("parallel",),      # disjoint output tiles in both passes
        vmem_limit_bytes=vmem_limit)

    # TODO(synk): single-buffer the grid-invariant operands (w1/w2/b2/gamma/beta
    # and the stats) via BlockSpec(..., pipeline_mode=pl.Buffered(1)) once that
    # path is verified on the target jaxlib; double-buffering them only costs a
    # few hundred KiB at these shapes.

    # ---- pass 1: per-batch-tile partial sum / sum-of-squares of h ----
    psum, psumsq = pl.pallas_call(
        _stats_kernel,
        out_shape=(jax.ShapeDtypeStruct((ntiles * 8, Hp), f32),
                   jax.ShapeDtypeStruct((ntiles * 8, Hp), f32)),
        grid=grid,
        in_specs=[pl.BlockSpec((tb, Fp), lambda i: (i, 0)),
                  pl.BlockSpec((Fp, Hp), lambda i: (0, 0))],
        out_specs=(pl.BlockSpec((8, Hp), lambda i: (i, 0)),
                   pl.BlockSpec((8, Hp), lambda i: (i, 0))),
        compiler_params=cparams,
    )(shared_bf, w1_bf)

    # ---- pass 2: h recompute + BN finalize + ReLU + matmul + sigmoid + gate ----
    kernel2 = functools.partial(_gate_kernel, inv_n=1.0 / (8.0 * B), eps=_EPS)
    out_p = pl.pallas_call(
        kernel2,
        out_shape=jax.ShapeDtypeStruct((B, Fp), f32),
        grid=grid,
        in_specs=[pl.BlockSpec((tb, Fp), lambda i: (i, 0)),           # shared (bf16)
                  pl.BlockSpec((tb, Fp), lambda i: (i, 0)),           # task   (f32)
                  pl.BlockSpec((Fp, Hp), lambda i: (0, 0)),           # w1     (bf16)
                  pl.BlockSpec((ntiles * 8, Hp), lambda i: (0, 0)),   # partial sums
                  pl.BlockSpec((ntiles * 8, Hp), lambda i: (0, 0)),   # partial sumsq
                  pl.BlockSpec((1, Hp), lambda i: (0, 0)),            # gamma
                  pl.BlockSpec((1, Hp), lambda i: (0, 0)),            # beta
                  pl.BlockSpec((Hp, Fp), lambda i: (0, 0)),           # w2     (bf16)
                  pl.BlockSpec((1, Fp), lambda i: (0, 0))],           # b2
        out_specs=pl.BlockSpec((tb, Fp), lambda i: (i, 0)),
        input_output_aliases={1: 0},            # reuse task's HBM buffer for out
        compiler_params=cparams,
    )(shared_bf, task_f, w1_bf, psum, psumsq, gamma_f, beta_f, w2_bf, b2_f)

    return out_p if Fp == F else out_p[:, :F]


if __name__ == "__main__":
    B = 256          # batch
    F = 256          # feature_dim (multiple of 128 -> no padding path)
    H = F // 2       # hidden width of the attention MLP (= 128)

    key = jax.random.PRNGKey(0)
    k_sh, k_ts, k_w1, k_b1, k_w2, k_b2 = jax.random.split(key, 6)

    shared = jax.random.normal(k_sh, (B, F), dtype=jnp.float32)
    task = jax.random.normal(k_ts, (B, F), dtype=jnp.float32)

    # PyTorch Linear weights (out, in) pre-transposed to (in, out).
    lim1 = 1.0 / (F ** 0.5)
    w1 = jax.random.uniform(k_w1, (F, H), minval=-lim1, maxval=lim1, dtype=jnp.float32)
    b1 = jax.random.uniform(k_b1, (1, H), minval=-lim1, maxval=lim1, dtype=jnp.float32)
    gamma = jnp.ones((1, H), jnp.float32)    # BatchNorm1d weight
    beta = jnp.zeros((1, H), jnp.float32)    # BatchNorm1d bias
    lim2 = 1.0 / (H ** 0.5)
    w2 = jax.random.uniform(k_w2, (H, F), minval=-lim2, maxval=lim2, dtype=jnp.float32)
    b2 = jax.random.uniform(k_b2, (1, F), minval=-lim2, maxval=lim2, dtype=jnp.float32)

    fwd = jax.jit(attention_gating)
    out = jax.block_until_ready(fwd(shared, task, w1, b1, gamma, beta, w2, b2))
    assert out.shape == (B, F) and out.dtype == jnp.float32

    # Reference A: exact PyTorch training-mode semantics in f32 (loose check —
    # the kernel deliberately streams the matmul operands in bf16).
    h32 = shared @ w1 + b1
    mu32 = h32.mean(0, keepdims=True)
    var32 = ((h32 - mu32) ** 2).mean(0, keepdims=True)
    hn32 = (h32 - mu32) / jnp.sqrt(var32 + _EPS) * gamma + beta
    a32 = jax.nn.sigmoid(jnp.maximum(hn32, 0.0) @ w2 + b2)
    ref32 = shared * a32 + task * (1.0 - a32)
    err32 = float(jnp.max(jnp.abs(out - ref32)))
    assert jnp.allclose(out, ref32, atol=1e-1, rtol=1e-1), f"f32-semantics err {err32}"

    # Reference B: same operand-precision policy as the kernel (bf16 matmul
    # operands, bf16-quantized shared in the gate) — tight check of the math.
    sh_bf = shared.astype(jnp.bfloat16)
    w1_bf = w1.astype(jnp.bfloat16)
    w2_bf = w2.astype(jnp.bfloat16)
    h = jnp.dot(sh_bf, w1_bf, preferred_element_type=jnp.float32) + b1
    mu = h.mean(0, keepdims=True)
    var = ((h - mu) ** 2).mean(0, keepdims=True)
    r = jnp.maximum((h - mu) / jnp.sqrt(var + _EPS) * gamma + beta, 0.0).astype(jnp.bfloat16)
    a = jax.nn.sigmoid(jnp.dot(r, w2_bf, preferred_element_type=jnp.float32) + b2)
    sh_q = sh_bf.astype(jnp.float32)
    ref = sh_q * a + task * (1.0 - a)
    err = float(jnp.max(jnp.abs(out - ref)))
    assert jnp.allclose(out, ref, atol=3e-3, rtol=3e-3), f"bf16-matched err {err}"

    print("KERNEL_OK")
</pallas_src>

<mosaic_0001>
module attributes {stable_mosaic.version = 11 : i64} {
  func.func @_stats_kernel(%arg0: i32, %arg1: memref<128x256xbf16, #tpu.memory_space<vmem>>, %arg2: memref<256x128xbf16, #tpu.memory_space<vmem>>, %arg3: memref<8x128xf32, #tpu.memory_space<vmem>>, %arg4: memref<8x128xf32, #tpu.memory_space<vmem>>) attributes {dimension_semantics = [#tpu.dimension_semantics<parallel>], iteration_bounds = array<i64: 2>, scalar_prefetch = 0 : i64, scratch_operands = 0 : i64, tpu.core_type = #tpu.core_type<tc>, window_params = [{transform_indices = @transform_0, window_bounds = array<i64: 128, 256>}, {pipeline_mode = #tpu.pipeline_mode<synchronous>, transform_indices = @transform_1, window_bounds = array<i64: 256, 128>}, {transform_indices = @transform_2, window_bounds = array<i64: 8, 128>}, {transform_indices = @transform_3, window_bounds = array<i64: 8, 128>}]} {
    %c0 = arith.constant 0 : index
    %c0_0 = arith.constant 0 : index
    %0 = vector.load %arg1[%c0, %c0_0] : memref<128x256xbf16, #tpu.memory_space<vmem>>, vector<128x256xbf16>
    %c0_1 = arith.constant 0 : index
    %c0_2 = arith.constant 0 : index
    %1 = vector.load %arg2[%c0_1, %c0_2] : memref<256x128xbf16, #tpu.memory_space<vmem>>, vector<256x128xbf16>
    %cst = arith.constant dense<0.000000e+00> : vector<128x128xf32>
    %2 = tpu.matmul %0, %1, %cst {dimension_numbers = #tpu.dot_dimension_numbers<[1], [0], [0], [1], [0, 0, 1, 1], [], []>} : vector<128x256xbf16>, vector<256x128xbf16>, vector<128x128xf32> -> vector<128x128xf32>
    %cst_3 = arith.constant dense<0.000000e+00> : vector<128xf32>
    %3 = vector.multi_reduction <add>, %2, %cst_3 [0] : vector<128x128xf32> to vector<128xf32>
    %4 = vector.shape_cast %3 : vector<128xf32> to vector<1x128xf32>
    %5 = vector.shape_cast %4 : vector<1x128xf32> to vector<1x128xf32>
    %6 = vector.broadcast %5 : vector<1x128xf32> to vector<8x128xf32>
    %c0_4 = arith.constant 0 : index
    %c0_5 = arith.constant 0 : index
    %7 = vector.load %arg3[%c0_4, %c0_5] : memref<8x128xf32, #tpu.memory_space<vmem>>, vector<8x128xf32>
    tpu.vector_store %arg3[%c0_4, %c0_5], %6 {strides = array<i32>} : memref<8x128xf32, #tpu.memory_space<vmem>>, vector<8x128xf32>,
    %8 = arith.mulf %2, %2 : vector<128x128xf32>
    %cst_6 = arith.constant dense<0.000000e+00> : vector<128xf32>
    %9 = vector.multi_reduction <add>, %8, %cst_6 [0] : vector<128x128xf32> to vector<128xf32>
    %10 = vector.shape_cast %9 : vector<128xf32> to vector<1x128xf32>
    %11 = vector.shape_cast %10 : vector<1x128xf32> to vector<1x128xf32>
    %12 = vector.broadcast %11 : vector<1x128xf32> to vector<8x128xf32>
    %c0_7 = arith.constant 0 : index
    %c0_8 = arith.constant 0 : index
    %13 = vector.load %arg4[%c0_7, %c0_8] : memref<8x128xf32, #tpu.memory_space<vmem>>, vector<8x128xf32>
    tpu.vector_store %arg4[%c0_7, %c0_8], %12 {strides = array<i32>} : memref<8x128xf32, #tpu.memory_space<vmem>>, vector<8x128xf32>,
    return
  }
  func.func @transform_0(%arg0: i32) -> (i32, i32) {
    %c0_i32 = arith.constant 0 : i32
    %c0_i32_0 = arith.constant 0 : i32
    return %arg0, %c0_i32 : i32, i32
  }
  func.func @transform_1(%arg0: i32) -> (i32, i32) {
    %c0_i32 = arith.constant 0 : i32
    %c0_i32_0 = arith.constant 0 : i32
    %c0_i32_1 = arith.constant 0 : i32
    return %c0_i32, %c0_i32_0 : i32, i32
  }
  func.func @transform_2(%arg0: i32) -> (i32, i32) {
    %c0_i32 = arith.constant 0 : i32
    %c0_i32_0 = arith.constant 0 : i32
    return %arg0, %c0_i32 : i32, i32
  }
  func.func @transform_3(%arg0: i32) -> (i32, i32) {
    %c0_i32 = arith.constant 0 : i32
    %c0_i32_0 = arith.constant 0 : i32
    return %arg0, %c0_i32 : i32, i32
  }
}

module attributes {stable_mosaic.version = 11 : i64} {
  func.func @_gate_kernel(%arg0: i32, %arg1: memref<128x256xbf16, #tpu.memory_space<vmem>>, %arg2: memref<128x256xf32, #tpu.memory_space<vmem>>, %arg3: memref<256x128xbf16, #tpu.memory_space<vmem>>, %arg4: memref<16x128xf32, #tpu.memory_space<vmem>>, %arg5: memref<16x128xf32, #tpu.memory_space<vmem>>, %arg6: memref<1x128xf32, #tpu.memory_space<vmem>>, %arg7: memref<1x128xf32, #tpu.memory_space<vmem>>, %arg8: memref<128x256xbf16, #tpu.memory_space<vmem>>, %arg9: memref<1x256xf32, #tpu.memory_space<vmem>>, %arg10: memref<128x256xf32, #tpu.memory_space<vmem>>) attributes {dimension_semantics = [#tpu.dimension_semantics<parallel>], iteration_bounds = array<i64: 2>, scalar_prefetch = 0 : i64, scratch_operands = 0 : i64, tpu.core_type = #tpu.core_type<tc>, window_params = [{transform_indices = @transform_0, window_bounds = array<i64: 128, 256>}, {transform_indices = @transform_1, window_bounds = array<i64: 128, 256>}, {pipeline_mode = #tpu.pipeline_mode<synchronous>, transform_indices = @transform_2, window_bounds = array<i64: 256, 128>}, {pipeline_mode = #tpu.pipeline_mode<synchronous>, transform_indices = @transform_3, window_bounds = array<i64: 16, 128>}, {pipeline_mode = #tpu.pipeline_mode<synchronous>, transform_indices = @transform_4, window_bounds = array<i64: 16, 128>}, {pipeline_mode = #tpu.pipeline_mode<synchronous>, transform_indices = @transform_5, window_bounds = array<i64: 1, 128>}, {pipeline_mode = #tpu.pipeline_mode<synchronous>, transform_indices = @transform_6, window_bounds = array<i64: 1, 128>}, {pipeline_mode = #tpu.pipeline_mode<synchronous>, transform_indices = @transform_7, window_bounds = array<i64: 128, 256>}, {pipeline_mode = #tpu.pipeline_mode<synchronous>, transform_indices = @transform_8, window_bounds = array<i64: 1, 256>}, {transform_indices = @transform_9, window_bounds = array<i64: 128, 256>}]} {
    %c0 = arith.constant 0 : index
    %c0_0 = arith.constant 0 : index
    %0 = vector.load %arg1[%c0, %c0_0] : memref<128x256xbf16, #tpu.memory_space<vmem>>, vector<128x256xbf16>
    %c0_1 = arith.constant 0 : index
    %c0_2 = arith.constant 0 : index
    %1 = vector.load %arg3[%c0_1, %c0_2] : memref<256x128xbf16, #tpu.memory_space<vmem>>, vector<256x128xbf16>
    %cst = arith.constant dense<0.000000e+00> : vector<128x128xf32>
    %2 = tpu.matmul %0, %1, %cst {dimension_numbers = #tpu.dot_dimension_numbers<[1], [0], [0], [1], [0, 0, 1, 1], [], []>} : vector<128x256xbf16>, vector<256x128xbf16>, vector<128x128xf32> -> vector<128x128xf32>
    %c0_3 = arith.constant 0 : index
    %c0_4 = arith.constant 0 : index
    %3 = vector.load %arg4[%c0_3, %c0_4] : memref<16x128xf32, #tpu.memory_space<vmem>>, vector<16x128xf32>
    %cst_5 = arith.constant dense<0.000000e+00> : vector<128xf32>
    %4 = vector.multi_reduction <add>, %3, %cst_5 [0] : vector<16x128xf32> to vector<128xf32>
    %5 = vector.shape_cast %4 : vector<128xf32> to vector<1x128xf32>
    %cst_6 = arith.constant 4.8828125E-4 : f32
    %6 = vector.broadcast %cst_6 : f32 to vector<1x128xf32>
    %7 = arith.mulf %5, %6 : vector<1x128xf32>
    %c0_7 = arith.constant 0 : index
    %c0_8 = arith.constant 0 : index
    %8 = vector.load %arg5[%c0_7, %c0_8] : memref<16x128xf32, #tpu.memory_space<vmem>>, vector<16x128xf32>
    %cst_9 = arith.constant dense<0.000000e+00> : vector<128xf32>
    %9 = vector.multi_reduction <add>, %8, %cst_9 [0] : vector<16x128xf32> to vector<128xf32>
    %10 = vector.shape_cast %9 : vector<128xf32> to vector<1x128xf32>
    %cst_10 = arith.constant 4.8828125E-4 : f32
    %11 = vector.broadcast %cst_10 : f32 to vector<1x128xf32>
    %12 = arith.mulf %10, %11 : vector<1x128xf32>
    %13 = arith.mulf %7, %7 : vector<1x128xf32>
    %14 = arith.subf %12, %13 : vector<1x128xf32>
    %cst_11 = arith.constant 0.000000e+00 : f32
    %15 = vector.broadcast %cst_11 : f32 to vector<1x128xf32>
    %16 = arith.maximumf %14, %15 : vector<1x128xf32>
    %c0_12 = arith.constant 0 : index
    %c0_13 = arith.constant 0 : index
    %17 = vector.load %arg6[%c0_12, %c0_13] : memref<1x128xf32, #tpu.memory_space<vmem>>, vector<1x128xf32>
    %cst_14 = arith.constant 9.99999974E-6 : f32
    %18 = vector.broadcast %cst_14 : f32 to vector<1x128xf32>
    %19 = arith.addf %16, %18 : vector<1x128xf32>
    %20 = math.rsqrt %19 : vector<1x128xf32>
    %21 = arith.mulf %17, %20 : vector<1x128xf32>
    %c0_15 = arith.constant 0 : index
    %c0_16 = arith.constant 0 : index
    %22 = vector.load %arg7[%c0_15, %c0_16] : memref<1x128xf32, #tpu.memory_space<vmem>>, vector<1x128xf32>
    %23 = arith.mulf %7, %21 : vector<1x128xf32>
    %24 = arith.subf %22, %23 : vector<1x128xf32>
    %25 = vector.broadcast %21 : vector<1x128xf32> to vector<128x128xf32>
    %26 = arith.mulf %2, %25 : vector<128x128xf32>
    %27 = vector.broadcast %24 : vector<1x128xf32> to vector<128x128xf32>
    %28 = arith.addf %26, %27 : vector<128x128xf32>
    %cst_17 = arith.constant 0.000000e+00 : f32
    %29 = vector.broadcast %cst_17 : f32 to vector<128x128xf32>
    %30 = arith.maximumf %28, %29 : vector<128x128xf32>
    %31 = arith.truncf %30 : vector<128x128xf32> to vector<128x128xbf16>
    %c0_18 = arith.constant 0 : index
    %c0_19 = arith.constant 0 : index
    %32 = vector.load %arg8[%c0_18, %c0_19] : memref<128x256xbf16, #tpu.memory_space<vmem>>, vector<128x256xbf16>
    %cst_20 = arith.constant dense<0.000000e+00> : vector<128x256xf32>
    %33 = tpu.matmul %31, %32, %cst_20 {dimension_numbers = #tpu.dot_dimension_numbers<[1], [0], [0], [1], [0, 0, 1, 1], [], []>} : vector<128x128xbf16>, vector<128x256xbf16>, vector<128x256xf32> -> vector<128x256xf32>
    %c0_21 = arith.constant 0 : index
    %c0_22 = arith.constant 0 : index
    %34 = vector.load %arg9[%c0_21, %c0_22] : memref<1x256xf32, #tpu.memory_space<vmem>>, vector<1x256xf32>
    %35 = vector.broadcast %34 : vector<1x256xf32> to vector<128x256xf32>
    %36 = arith.addf %33, %35 : vector<128x256xf32>
    %37 = arith.negf %36 : vector<128x256xf32>
    %38 = math.exp %37 : vector<128x256xf32>
    %cst_23 = arith.constant 1.000000e+00 : f32
    %39 = vector.broadcast %cst_23 : f32 to vector<128x256xf32>
    %40 = arith.addf %39, %38 : vector<128x256xf32>
    %41 = arith.divf %39, %40 : vector<128x256xf32>
    %c0_24 = arith.constant 0 : index
    %c0_25 = arith.constant 0 : index
    %42 = vector.load %arg2[%c0_24, %c0_25] : memref<128x256xf32, #tpu.memory_space<vmem>>, vector<128x256xf32>
    %43 = arith.extf %0 : vector<128x256xbf16> to vector<128x256xf32>
    %44 = arith.subf %43, %42 : vector<128x256xf32>
    %45 = arith.mulf %41, %44 : vector<128x256xf32>
    %46 = arith.addf %42, %45 : vector<128x256xf32>
    %c0_26 = arith.constant 0 : index
    %c0_27 = arith.constant 0 : index
    %47 = vector.load %arg10[%c0_26, %c0_27] : memref<128x256xf32, #tpu.memory_space<vmem>>, vector<128x256xf32>
    tpu.vector_store %arg10[%c0_26, %c0_27], %46 {strides = array<i32>} : memref<128x256xf32, #tpu.memory_space<vmem>>, vector<128x256xf32>,
    return
  }
  func.func @transform_0(%arg0: i32) -> (i32, i32) {
    %c0_i32 = arith.constant 0 : i32
    %c0_i32_0 = arith.constant 0 : i32
    return %arg0, %c0_i32 : i32, i32
  }
  func.func @transform_1(%arg0: i32) -> (i32, i32) {
    %c0_i32 = arith.constant 0 : i32
    %c0_i32_0 = arith.constant 0 : i32
    return %arg0, %c0_i32 : i32, i32
  }
  func.func @transform_2(%arg0: i32) -> (i32, i32) {
    %c0_i32 = arith.constant 0 : i32
    %c0_i32_0 = arith.constant 0 : i32
    %c0_i32_1 = arith.constant 0 : i32
    return %c0_i32, %c0_i32_0 : i32, i32
  }
  func.func @transform_3(%arg0: i32) -> (i32, i32) {
    %c0_i32 = arith.constant 0 : i32
    %c0_i32_0 = arith.constant 0 : i32
    %c0_i32_1 = arith.constant 0 : i32
    return %c0_i32, %c0_i32_0 : i32, i32
  }
  func.func @transform_4(%arg0: i32) -> (i32, i32) {
    %c0_i32 = arith.constant 0 : i32
    %c0_i32_0 = arith.constant 0 : i32
    %c0_i32_1 = arith.constant 0 : i32
    return %c0_i32, %c0_i32_0 : i32, i32
  }
  func.func @transform_5(%arg0: i32) -> (i32, i32) {
    %c0_i32 = arith.constant 0 : i32
    %c0_i32_0 = arith.constant 0 : i32
    %c0_i32_1 = arith.constant 0 : i32
    return %c0_i32, %c0_i32_0 : i32, i32
  }
  func.func @transform_6(%arg0: i32) -> (i32, i32) {
    %c0_i32 = arith.constant 0 : i32
    %c0_i32_0 = arith.constant 0 : i32
    %c0_i32_1 = arith.constant 0 : i32
    return %c0_i32, %c0_i32_0 : i32, i32
  }
  func.func @transform_7(%arg0: i32) -> (i32, i32) {
    %c0_i32 = arith.constant 0 : i32
    %c0_i32_0 = arith.constant 0 : i32
    %c0_i32_1 = arith.constant 0 : i32
    return %c0_i32, %c0_i32_0 : i32, i32
  }
  func.func @transform_8(%arg0: i32) -> (i32, i32) {
    %c0_i32 = arith.constant 0 : i32
    %c0_i32_0 = arith.constant 0 : i32
    %c0_i32_1 = arith.constant 0 : i32
    return %c0_i32, %c0_i32_0 : i32, i32
  }
  func.func @transform_9(%arg0: i32) -> (i32, i32) {
    %c0_i32 = arith.constant 0 : i32
    %c0_i32_0 = arith.constant 0 : i32
    return %arg0, %c0_i32 : i32, i32
  }
}

</mosaic_0001>

<bundles_post_ra>
// kernel: attention_gating.2
= control target key start
LH: loop header
LB: loop body
LE: loop exit
PB: predicated region body
PF: predicated region fallthrough
CT: control target
= control target key end

     0   :  { %s852_s12 = smov 0   ;;  %s948_s0 = inlined_call_operand.vmem [shape: bf16[256,256], index: 0, kind: input, shape index: {}]   ;;  %s949_s1 = inlined_call_operand.vmem [shape: bf16[256,128], index: 1, kind: input, shape index: {}]   ;;  %s950_s2 = inlined_call_operand.vmem [shape: f32[16,128], index: 2, kind: output, shape index: {0}]   ;;  %s951_s3 = inlined_call_operand.vmem [shape: f32[16,128], index: 3, kind: output, shape index: {1}]  }
   0x1 LB: > { %s858_s13 = sadd.s32 4294967295, %s830_s12   ;;  %p655_p0 = scmp.ge.s32.totalorder %s830_s12, 1  ;;  %s830_s12 = sphi %s852_s12, %s14_s12  }
   0x2   : > { %p142_p1 = scmp.lt.s32.totalorder %s830_s12, 3 }
   0x4   : > { %p143_p2 = pnand %p655_p0, %p142_p1 }
   0x5   : > { %v784_v0 = vld [vmem:[%s949_s1 + $0x40] sm:$0xff] (!%p143_p2)   ;;  %s656_s16 = sshll.u32 (!%p143_p2), %s858_s13, 4  ;;  %v786_v2 = vld [vmem:[%s949_s1 + $0x48] sm:$0xff] (!%p143_p2)   ;;  %v788_v4 = vld [vmem:[%s949_s1 + $0x50] sm:$0xff] (!%p143_p2)   ;;  %p177_p4 = scmp.lt.s32.totalorder (!%p143_p2), %s858_s13, 1 }
   0x6   : > { %146 = sbr.rel (%p143_p2) target bundleno = 312 (0x138), region = 28  ;;  %v785_v1 = vld [vmem:[%s949_s1] sm:$0xff] (!%p143_p2)   ;;  %696 = vmatprep.subr.bf16.mxu0 (!%p143_p2), %v784_v0  ;;  %760 = vmatprep.subr.bf16.mxu1 (!%p143_p2), %v784_v0  ;;  %v787_v3 = vld [vmem:[%s949_s1 + $0x8] sm:$0xff] (!%p143_p2)   ;;  %p171_p3 = scmp.lt.s32.totalorder (!%p143_p2), %s656_s16, 31  ;;  %v789_v5 = vld [vmem:[%s949_s1 + $0x10] sm:$0xff] (!%p143_p2)  }
   0x7   : > { %697 = vmatpush3.bf16.msra.mxu0 (!%p143_p2), %v785_v1  ;;  %768 = vmatpush3.bf16.msra.mxu1 (!%p143_p2), %v785_v1  ;;  %v790_v6 = vld [vmem:[%s949_s1 + $0x58] sm:$0xff] (!%p143_p2)   ;;  %v792_v8 = vld [vmem:[%s949_s1 + $0x60] sm:$0xff] (!%p143_p2)   ;;  %v794_v10 = vld [vmem:[%s949_s1 + $0x68] sm:$0xff] (!%p143_p2)  }
   0x8   : > { %698 = vmatprep.subr.bf16.mxu0 (!%p143_p2), %v786_v2  ;;  %761 = vmatprep.subr.bf16.mxu1 (!%p143_p2), %v786_v2  ;;  %v791_v7 = vld [vmem:[%s949_s1 + $0x18] sm:$0xff] (!%p143_p2)   ;;  %v793_v9 = vld [vmem:[%s949_s1 + $0x20] sm:$0xff] (!%p143_p2)   ;;  %v795_v12 = vld [vmem:[%s949_s1 + $0x28] sm:$0xff] (!%p143_p2)  }
   0x9   : > { %v796_v14 = vld [vmem:[%s949_s1 + $0x70] sm:$0xff] (!%p143_p2)   ;;  %v798_v16 = vld [vmem:[%s949_s1 + $0x78] sm:$0xff] (!%p143_p2)  }
   0xa   : > { %v797_v15 = vld [vmem:[%s949_s1 + $0x30] sm:$0xff] (!%p143_p2)   ;;  %v799_v17 = vld [vmem:[%s949_s1 + $0x38] sm:$0xff] (!%p143_p2)  }
   0xb   : > { %699 = vmatpush3.bf16.msra.mxu0 (!%p143_p2), %v787_v3  ;;  %769 = vmatpush3.bf16.msra.mxu1 (!%p143_p2), %v787_v3 }
   0xc   : > { %700 = vmatprep.subr.bf16.mxu0 (!%p143_p2), %v788_v4  ;;  %762 = vmatprep.subr.bf16.mxu1 (!%p143_p2), %v788_v4 }
   0xd   : > { %s953_s16 = smov (!%p171_p3, %s656_s16), 31  ;;  %s955_s13 = smov (!%p177_p4, %s858_s13), 1 }
   0xe   : > { %s695_s4 = sshll.u32 %s953_s16, 3  ;;  %s659_s26 = sshll.u32 %s955_s13, 3 }
   0xf   : > { %701 = vmatpush3.bf16.msra.mxu0 %v789_v5  ;;  %770 = vmatpush3.bf16.msra.mxu1 %v789_v5  ;;  %s893_s9 = scalar_lea.vmem %s948_s0, %s695_s4  ;;  %s180_s29 = scalar_lea.vmem %s950_s2, %s659_s26 }
  0x10   : > { %702 = vmatprep.subr.bf16.mxu0 %v790_v6  ;;  %763 = vmatprep.subr.bf16.mxu1 %v790_v6  ;;  %v802_v11 = vld [vmem:[%s893_s9 + $0x4] ss:$8 sps:$4 sm:$0xff]   ;;  %v800_v18 = vld [vmem:[%s893_s9] ss:$8 sps:$4 sm:$0xff]   ;;  %v803_v20 = vld [vmem:[%s893_s9 + $0x14] ss:$8 sps:$4 sm:$0xff]   ;;  %s184_s5 = scalar_lea.vmem %s951_s3, %s659_s26 }
  0x11   : > { %v808_v13 = vld [vmem:[%s893_s9 + $0x44] ss:$8 sps:$4 sm:$0xff]   ;;  %442 = vmatprep.mubr.bf16.mxu0 %v802_v11  ;;  %v806_v19 = vld [vmem:[%s893_s9 + $0x40] ss:$8 sps:$4 sm:$0xff]   ;;  %v812_v21 = vld [vmem:[%s893_s9 + $0x54] ss:$8 sps:$4 sm:$0xff]  }
  0x12   : > { %474 = vmatprep.mubr.bf16.mxu1 %v808_v13  ;;  %v805_v22 = vld [vmem:[%s893_s9 + $0x10] ss:$8 sps:$4 sm:$0xff]   ;;  %v809_v24 = vld [vmem:[%s893_s9 + $0x24] ss:$8 sps:$4 sm:$0xff]   ;;  %v811_v26 = vld [vmem:[%s893_s9 + $0x20] ss:$8 sps:$4 sm:$0xff]  }
  0x13   : > { %703 = vmatpush3.bf16.msra.mxu0 %v791_v7  ;;  %771 = vmatpush3.bf16.msra.mxu1 %v791_v7  ;;  %v814_v23 = vld [vmem:[%s893_s9 + $0x50] ss:$8 sps:$4 sm:$0xff]   ;;  %v818_v25 = vld [vmem:[%s893_s9 + $0x64] ss:$8 sps:$4 sm:$0xff]   ;;  %v820_v27 = vld [vmem:[%s893_s9 + $0x60] ss:$8 sps:$4 sm:$0xff]  }
  0x14   : > { %704 = vmatprep.subr.bf16.mxu0 %v792_v8  ;;  %764 = vmatprep.subr.bf16.mxu1 %v792_v8  ;;  %v815_v28 = vld [vmem:[%s893_s9 + $0x34] ss:$8 sps:$4 sm:$0xff]   ;;  %v817_v30 = vld [vmem:[%s893_s9 + $0x30] ss:$8 sps:$4 sm:$0xff]  }
  0x15   : > { %v821_v29 = vld [vmem:[%s893_s9 + $0x74] ss:$8 sps:$4 sm:$0xff]   ;;  %v823_v31 = vld [vmem:[%s893_s9 + $0x70] ss:$8 sps:$4 sm:$0xff]  }
  0x17   : > { %705 = vmatpush3.bf16.msra.mxu0 %v793_v9  ;;  %772 = vmatpush3.bf16.msra.mxu1 %v793_v9 }
  0x18   : > { %706 = vmatprep.subr.bf16.mxu0 %v794_v10  ;;  %765 = vmatprep.subr.bf16.mxu1 %v794_v10 }
  0x1b   : > { %707 = vmatpush3.bf16.msra.mxu0 %v795_v12  ;;  %773 = vmatpush3.bf16.msra.mxu1 %v795_v12 }
  0x1c   : > { %708 = vmatprep.subr.bf16.mxu0 %v796_v14  ;;  %766 = vmatprep.subr.bf16.mxu1 %v796_v14 }
  0x1f   : > { %709 = vmatpush3.bf16.msra.mxu0 %v797_v15  ;;  %774 = vmatpush3.bf16.msra.mxu1 %v797_v15 }
  0x20   : > { %710 = vmatprep.subr.bf16.mxu0 %v798_v16  ;;  %767 = vmatprep.subr.bf16.mxu1 %v798_v16 }
  0x23   : > { %711 = vmatpush3.bf16.msra.mxu0 %v799_v17  ;;  %775 = vmatpush3.bf16.msra.mxu1 %v799_v17 }
  0x26   : > { %443 = vmatmul.mubr.bf16.vlgmr.msra.gmra.mrb[0].mxu0 %v800_v18  ;;  %475 = vmatmul.mubr.bf16.vlgmr.msra.gmra.mrb[0].mxu1 %v806_v19 }
  0x27   : > { %450 = vmatprep.mubr.bf16.mxu0 %v803_v20  ;;  %482 = vmatprep.mubr.bf16.mxu1 %v812_v21 }
  0x2e   : > { %451 = vmatmul.mubr.bf16.gmra.mrb[4].mxu0 %v805_v22  ;;  %483 = vmatmul.mubr.bf16.gmra.mrb[4].mxu1 %v814_v23 }
  0x2f   : > { %458 = vmatprep.mubr.bf16.mxu0 %v809_v24  ;;  %490 = vmatprep.mubr.bf16.mxu1 %v818_v25 }
  0x36   : > { %459 = vmatmul.mubr.bf16.gmra.mrb[8].mxu0 %v811_v26  ;;  %491 = vmatmul.mubr.bf16.gmra.mrb[8].mxu1 %v820_v27 }
  0x37   : > { %466 = vmatprep.mubr.bf16.mxu0 %v815_v28  ;;  %498 = vmatprep.mubr.bf16.mxu1 %v821_v29 }
  0x3e   : > { %467 = vmatmul.mubr.bf16.gmra.mrb[12].mxu0 %v817_v30  ;;  %499 = vmatmul.mubr.bf16.gmra.mrb[12].mxu1 %v823_v31 }
  0xf9   : > { %v712_v32 = vpop.f32.mrb[0].mxu0  ;;  %v736_v33 = vpop.f32.mrb[0].mxu1 }
  0xfa   : > { %v713_v34 = vpop.f32.mrb[1].mxu0  ;;  %v737_v35 = vpop.f32.mrb[1].mxu1 }
  0xfb   : > { %v714_v36 = vadd.f32 %v713_v34, %v712_v32  ;;  %v715_v37 = vpop.f32.mrb[2].mxu0  ;;  %v932_v38 = vadd.f32 %v737_v35, %v736_v33  ;;  %v739_v39 = vpop.f32.mrb[2].mxu1 }
  0xfc   : > { %v716_v40 = vpop.f32.mrb[3].mxu0  ;;  %v740_v41 = vpop.f32.mrb[3].mxu1 }
  0xfd   : > { %v717_v42 = vadd.f32 %v716_v40, %v715_v37  ;;  %v741_v43 = vadd.f32 %v740_v41, %v739_v39  ;;  %v529_v44 = vmul.f32 %v714_v36, %v714_v36  ;;  %v537_v37 = vmul.f32 %v932_v38, %v932_v38 }
  0xff   : > { %v507_v45 = vadd.f32 %v717_v42, %v714_v36  ;;  %v530_v46 = vmul.f32 %v717_v42, %v717_v42  ;;  %v538_v41 = vmul.f32 %v741_v43, %v741_v43 }
 0x101   : > { %v545_v47 = vadd.f32 %v530_v46, %v529_v44  ;;  %v718_v48 = vpop.f32.mrb[4].mxu0  ;;  %v742_v49 = vpop.f32.mrb[4].mxu1 }
 0x102   : > { %v719_v50 = vpop.f32.mrb[5].mxu0  ;;  %v743_v51 = vpop.f32.mrb[5].mxu1 }
 0x103   : > { %v720_v52 = vadd.f32 %v719_v50, %v718_v48  ;;  %v721_v53 = vpop.f32.mrb[6].mxu0  ;;  %v744_v54 = vadd.f32 %v743_v51, %v742_v49  ;;  %v745_v55 = vpop.f32.mrb[6].mxu1 }
 0x104   : > { %v722_v56 = vpop.f32.mrb[7].mxu0  ;;  %v746_v57 = vpop.f32.mrb[7].mxu1 }
 0x105   : > { %v508_v58 = vadd.f32 %v720_v52, %v507_v45  ;;  %v531_v59 = vmul.f32 %v720_v52, %v720_v52  ;;  %v723_v60 = vadd.f32 %v722_v56, %v721_v53  ;;  %v747_v61 = vadd.f32 %v746_v57, %v745_v55 }
 0x106   : > { %v539_v45 = vmul.f32 %v744_v54, %v744_v54 }
 0x107   : > { %v546_v62 = vadd.f32 %v545_v47, %v531_v59  ;;  %v509_v63 = vadd.f32 %v723_v60, %v508_v58  ;;  %v532_v0 = vmul.f32 %v723_v60, %v723_v60  ;;  %v540_v48 = vmul.f32 %v747_v61, %v747_v61 }
 0x109   : > { %v547_v1 = vadd.f32 %v546_v62, %v532_v0  ;;  %v724_v2 = vpop.f32.mrb[8].mxu0  ;;  %v748_v3 = vpop.f32.mrb[8].mxu1 }
 0x10a   : > { %v725_v4 = vpop.f32.mrb[9].mxu0  ;;  %v749_v5 = vpop.f32.mrb[9].mxu1 }
 0x10b   : > { %v726_v6 = vadd.f32 %v725_v4, %v724_v2  ;;  %v727_v7 = vpop.f32.mrb[10].mxu0  ;;  %v750_v8 = vadd.f32 %v749_v5, %v748_v3  ;;  %v751_v9 = vpop.f32.mrb[10].mxu1 }
 0x10c   : > { %v728_v10 = vpop.f32.mrb[11].mxu0  ;;  %v752_v11 = vpop.f32.mrb[11].mxu1 }
 0x10d   : > { %v510_v12 = vadd.f32 %v726_v6, %v509_v63  ;;  %v533_v13 = vmul.f32 %v726_v6, %v726_v6  ;;  %v729_v14 = vadd.f32 %v728_v10, %v727_v7  ;;  %v753_v15 = vadd.f32 %v752_v11, %v751_v9 }
 0x10e   : > { %v541_v52 = vmul.f32 %v750_v8, %v750_v8 }
 0x10f   : > { %v548_v16 = vadd.f32 %v547_v1, %v533_v13  ;;  %v511_v17 = vadd.f32 %v729_v14, %v510_v12  ;;  %v534_v18 = vmul.f32 %v729_v14, %v729_v14  ;;  %v542_v57 = vmul.f32 %v753_v15, %v753_v15 }
 0x111   : > { %v549_v19 = vadd.f32 %v548_v16, %v534_v18  ;;  %v730_v20 = vpop.f32.mrb[12].mxu0  ;;  %v754_v21 = vpop.f32.mrb[12].mxu1 }
 0x112   : > { %v731_v22 = vpop.f32.mrb[13].mxu0  ;;  %v755_v23 = vpop.f32.mrb[13].mxu1 }
 0x113   : > { %v732_v24 = vadd.f32 %v731_v22, %v730_v20  ;;  %v733_v25 = vpop.f32.mrb[14].mxu0  ;;  %v756_v26 = vadd.f32 %v755_v23, %v754_v21  ;;  %v757_v27 = vpop.f32.mrb[14].mxu1 }
 0x114   : > { %v734_v28 = vpop.f32.mrb[15].mxu0  ;;  %v758_v29 = vpop.f32.mrb[15].mxu1 }
 0x115   : > { %v512_v30 = vadd.f32 %v732_v24, %v511_v17  ;;  %v535_v31 = vmul.f32 %v732_v24, %v732_v24  ;;  %v735_v32 = vadd.f32 %v734_v28, %v733_v25  ;;  %v759_v33 = vadd.f32 %v758_v29, %v757_v27 }
 0x116   : > { %v543_v58 = vmul.f32 %v756_v26, %v756_v26 }
 0x117   : > { %v550_v34 = vadd.f32 %v549_v19, %v535_v31  ;;  %v513_v35 = vadd.f32 %v735_v32, %v512_v30  ;;  %v536_v36 = vmul.f32 %v735_v32, %v735_v32  ;;  %v544_v62 = vmul.f32 %v759_v33, %v759_v33 }
 0x119   : > { %v514_v39 = vadd.f32 %v932_v38, %v513_v35  ;;  %v551_v40 = vadd.f32 %v550_v34, %v536_v36 }
 0x11b   : > { %v515_v42 = vadd.f32 %v741_v43, %v514_v39  ;;  %v552_v44 = vadd.f32 %v551_v40, %v537_v37 }
 0x11d   : > { %v553_v46 = vadd.f32 %v552_v44, %v538_v41  ;;  %v516_v47 = vadd.f32 %v744_v54, %v515_v42 }
 0x11f   : > { %v517_v49 = vadd.f32 %v747_v61, %v516_v47  ;;  %v554_v50 = vadd.f32 %v553_v46, %v539_v45 }
 0x121   : > { %v518_v51 = vadd.f32 %v750_v8, %v517_v49  ;;  %v555_v53 = vadd.f32 %v554_v50, %v540_v48 }
 0x123   : > { %v556_v55 = vadd.f32 %v555_v53, %v541_v52  ;;  %v519_v56 = vadd.f32 %v753_v15, %v518_v51 }
 0x125   : > { %v557_v38 = vadd.f32 %v556_v55, %v542_v57  ;;  %v520_v59 = vadd.f32 %v756_v26, %v519_v56 }
 0x127   : > { %v558_v60 = vadd.f32 %v557_v38, %v543_v58  ;;  %v521_v43 = vadd.f32 %v759_v33, %v520_v59 }
 0x129   : > { %v522_v63 = vrot.slane %v521_v43, 4  ;;  %v559_v0 = vadd.f32 %v558_v60, %v544_v62 }
 0x12b   : > { %v523_v54 = vadd.f32 %v522_v63, %v521_v43  ;;  %v560_v61 = vrot.slane %v559_v0, 4 }
 0x12d   : > { %v524_v1 = vrot.slane %v523_v54, 2  ;;  %v561_v2 = vadd.f32 %v560_v61, %v559_v0 }
 0x12f   : > { %v525_v3 = vadd.f32 %v524_v1, %v523_v54  ;;  %v562_v4 = vrot.slane %v561_v2, 2 }
 0x131   : > { %v526_v5 = vrot.slane %v525_v3, 1  ;;  %v563_v6 = vadd.f32 %v562_v4, %v561_v2 }
 0x133   : > { %v527_v7 = vadd.f32 %v526_v5, %v525_v3  ;;  %v564_v8 = vrot.slane %v563_v6, 1 }
 0x135   : > { %528 = vst [vmem:[%s180_s29] sm:$0xff] %v527_v7  ;;  %v565_v9 = vadd.f32 %v564_v8, %v563_v6 }
 0x137   : > { %566 = vst [vmem:[%s184_s5] sm:$0xff] %v565_v9 }
 0x138 PF: > { %s14_s12 = sadd.s32 1, %s830_s12  }
 0x139   : > { %p11_p5 = scmp.ge.s32.totalorder %s14_s12, 4  }
 0x13b   :  { %13 = sbr.rel (!%p11_p5) target bundleno = 1 (0x1), region = 70 }

// kernel: attention_gating.3
= control target key start
LH: loop header
LB: loop body
LE: loop exit
PB: predicated region body
PF: predicated region fallthrough
CT: control target
= control target key end

     0   :  { %s2701_s0 = inlined_call_operand.vmem [shape: bf16[256,256], index: 0, kind: input, shape index: {}]   ;;  %s2702_s1 = inlined_call_operand.hbm [shape: f32[256,256], index: 1, kind: input, shape index: {}, may-alias: {1,9}]   ;;  %s2703_s2 = inlined_call_operand.vmem [shape: bf16[256,128], index: 2, kind: input, shape index: {}]   ;;  %s2704_s3 = inlined_call_operand.vmem [shape: f32[16,128], index: 3, kind: input, shape index: {}]   ;;  %s2705_s4 = inlined_call_operand.vmem [shape: f32[16,128], index: 4, kind: input, shape index: {}]   ;;  %s2706_s5 = inlined_call_operand.vmem [shape: f32[1,128], index: 5, kind: input, shape index: {}]   ;;  %s2707_s6 = inlined_call_operand.vmem [shape: f32[1,128], index: 6, kind: input, shape index: {}]   ;;  %s2708_s7 = inlined_call_operand.vmem [shape: bf16[128,256], index: 7, kind: input, shape index: {}]   ;;  %s2709_s8 = inlined_call_operand.vmem [shape: f32[1,256], index: 8, kind: input, shape index: {}]   ;;  %s2710_s9 = inlined_call_operand.hbm [shape: f32[256,256], index: 9, kind: output, shape index: {}, may-alias: {1,9}]  }
   0x1   :  { %2713 = sst [smem:[#allocation9_spill]] %s2702_s1 }
   0x2   :  { %14 = vsyncpa [#allocation3], 0 }
   0x3   :  { %16 = vsyncpa [#allocation3 + $0x1], 0 }
   0x4   :  { %17 = vsyncpa [#allocation4], 0 }
   0x5   :  { %19 = vsyncpa [#allocation4 + $0x1], 0  ;;  %s2070_s30 = smov 0   ;;  %s2072_s10 = smov 0  }
   0x6   :  { %s2074_s11 = smov 0   ;;  %s2076_s12 = smov 0  }
   0x7 LB: > { %s2091_s13 = sadd.s32 4294967295, %s2011_s12   ;;  %s1504_s14 = sadd.s32 4294967294, %s2011_s12   ;;  %s2011_s12 = sphi %s2076_s12, %s2729_s12   ;;  %s2007_s11 = sphi %s2074_s11, %s2728_s11   ;;  %s2003_s10 = sphi %s2072_s10, %s2727_s10   ;;  %s1999_s30 = sphi %s2070_s30, %s2726_s30  }
   0x8   : > { %s2095_s15 = sadd.s32 1, %s2011_s12   ;;  %s58_s16 = sadd.s32 1, %s2007_s11 }
   0x9   : > { %s55_s17 = ssub.s32 %s2011_s12, %s2095_s15  ;;  %p65_p0 = scmp.ne.s32.totalorder %s2007_s11, %s2003_s10 }
   0xa   : > { %p56_p1 = scmp.eq.s32.totalorder %s55_s17, 0  ;;  %p66_p2 = scmp.eq.s32.totalorder %s2011_s12, 0 }
   0xb   : > { %p71_p3 = scmp.ne.s32.totalorder %s2003_s10, %s1999_s30  ;;  %p72_p4 = scmp.eq.s32.totalorder %s2091_s13, 0 }
   0xc   : > { %s2107_s18 = scalar_select %p56_p1, %s2007_s11, %s58_s16  }
   0xd   : > { %p2109_p5 = por %p66_p2, %p65_p0  ;;  %p2113_p6 = por %p72_p4, %p71_p3 }
   0xe   : > { %2714 = sst [smem:[#allocation8_spill]] %s2107_s18  ;;  %p242_p7 = scmp.eq.s32.totalorder %s2091_s13, 1 }
   0xf   : > { %p248_p8 = scmp.eq.s32.totalorder %s1504_s14, 1  ;;  %p1684_p10 = scmp.lt.s32.totalorder %s2011_s12, 2 }
  0x10   : > { %p2120_p11 = por %p242_p7, %p65_p0  ;;  %s299_s23 = sand.u32 1, %s2007_s11  }
  0x11   : > { %p2124_p12 = por %p248_p8, %p71_p3  ;;  %s1604_s24 = sshll.u32 %s2011_s12, 12 }
  0x12   : > { %s2717_s21 = scalar_select %p2120_p11, 1, 0 }
  0x13   : > { %s2718_s22 = scalar_select %p2124_p12, 1, 0 }
  0x14   : > { %s1507_s25 = sshll.u32 %s299_s23, 8  ;;  %s2719_s1 = sld [smem:[#allocation9_spill]] }
  0x15   : > { %s303_s29 = scalar_lea.vmem [#allocation2], %s1507_s25  ;;  %p2137_p13 = pnand %p1684_p10, %p2109_p5 }
  0x16   : > { %s311_s14 = sshll.u32 %s303_s29, 4  ;;  %s2143_s17 = scalar_lea.sflag [#allocation3], %s299_s23  ;;  %s2141_s14 = int_to_ptr.vmem [resolvable:$true] %s311_s14 }
  0x17   : > { %p1917_p1 = pneg %p2137_p13 }
  0x1a   : > { %s2133_s28 = scalar_lea.hbm %s2719_s1, %s1604_s24  ;;  %s1920_s25 = scalar_lea.hbm %s2719_s1, 8192 }
  0x1b   : > { %s1915_s26 = scalar_lea.hbm %s2133_s28, 4096  ;;  %p1921_p4 = scmp.lt.u32.totalorder %s2133_s28, %s2719_s1 }
  0x1c   : > { %p1916_p0 = scmp.ne.s32.totalorder %s2133_s28, %s1915_s26  ;;  %p1922_p5 = scmp.lt.u32.totalorder %s1920_s25, %s1915_s26 }
  0x1d   : > { %p1924_p8 = scmp.lt.u32.totalorder %s1915_s26, %s2133_s28 }
  0x1e   : > { %p1918_p2 = pnand %p1917_p1, %p1916_p0  ;;  %p1923_p7 = por %p1922_p5, %p1921_p4 }
  0x20   : > { %p1919_p3 = pneg %p1918_p2  ;;  %p1925_p10 = por %p1924_p8, %p1923_p7 }
  0x22   : > { %p1926_p9 = pnand %p1925_p10, %p1919_p3 }
  0x24   : > { %1929 = shalt.err (!%p1926_p9)
}
  0x25   : > { %s1930_s23 = scalar_lea.vmem %s2141_s14, 4096  ;;  %s2013_s24 = smov [#allocation2]  }
  0x26   : > { %p1931_p0 = scmp.ne.s32.totalorder %s2141_s14, %s1930_s23  ;;  %s1935_s19 = sshll.u32 %s2013_s24, 4  ;;  %s1936_s19 = int_to_ptr.vmem [resolvable:$false] %s1935_s19 }
  0x27   : > { %s1937_s27 = scalar_lea.vmem %s1936_s19, 8192  ;;  %p1938_p11 = scmp.lt.s32.totalorder %s2141_s14, %s1936_s19 }
  0x28   : > { %p1933_p2 = pnand %p1931_p0, %p1917_p1  ;;  %p1939_p4 = scmp.lt.s32.totalorder %s1937_s27, %s1930_s23 }
  0x2a   : > { %p1934_p12 = pneg %p1933_p2  ;;  %p1940_p5 = por %p1939_p4, %p1938_p11 }
  0x2c   : > { %p1941_p7 = pnand %p1940_p5, %p1934_p12 }
  0x2e   : > { %1944 = shalt.err (!%p1941_p7)
}
  0x2f   : > { %s2014_s26 = smov 256   ;;  %s2015_s25 = smov 16  }
  0x30   : > { %1679 = dma.hbm_to_vmem [thread:$0]  (!%p2137_p13), %s2133_s28, 4096, %s2141_s14, %s2143_s17, %s2014_s26, %s2014_s26, %s2015_s25  }
  0x31   : > { %p1511_p9 = scmp.ge.s32.totalorder %s2011_s12, 1  ;;  %p319_p1 = scmp.lt.s32.totalorder %s2011_s12, 3 }
  0x33   : > { %p320_p3 = pnand %p1511_p9, %p319_p1 }
  0x34   : > { %s2174_s29 = sand.u32 (!%p320_p3), 1, %s2003_s10  }
  0x35   : > { %323 = sbr.rel (%p320_p3) target bundleno = 640 (0x280), region = 56  ;;  %s2712_s23 = sshll.u32 (!%p320_p3), %s2174_s29, 8 }
  0x36   : > { %s326_s24 = scalar_lea.sflag (!%p320_p3), [#allocation3], %s2174_s29  ;;  %s2180_s19 = scalar_lea.vmem (!%p320_p3), [#allocation2], %s2712_s23 }
  0x3c   : > { %1990 = dma.done.wait (%p2113_p6), %s326_s24, 4096  }
  0x3d   : > { %1992 = vsyncadd (%p2113_p6), %s326_s24, 4294963200  ;;  %s1514_s28 = sshll.u32 %s2091_s13, 4  ;;  %v1723_v0 = vld [vmem:[%s2703_s2 + $0x40] sm:$0xff]   ;;  %v1725_v2 = vld [vmem:[%s2703_s2 + $0x48] sm:$0xff]   ;;  %p2722_p12 = scmp.ne.s32.totalorder %s2717_s21, 0 }
  0x3e   : > { %v1724_v1 = vld [vmem:[%s2703_s2] sm:$0xff]   ;;  %1608 = vmatprep.subr.bf16.mxu0 %v1723_v0  ;;  %p371_p11 = scmp.lt.s32.totalorder %s1514_s28, 31  ;;  %v1726_v3 = vld [vmem:[%s2703_s2 + $0x8] sm:$0xff]   ;;  %v1727_v4 = vld [vmem:[%s2703_s2 + $0x50] sm:$0xff]   ;;  %v2016_v0 = vmov 0   ;;  %s2017_s16 = smov [#allocation5]  }
  0x3f   : > { %1609 = vmatpush3.bf16.msra.mxu0 %v1724_v1  ;;  %v1728_v5 = vld [vmem:[%s2703_s2 + $0x10] sm:$0xff]   ;;  %v1729_v6 = vld [vmem:[%s2703_s2 + $0x58] sm:$0xff]   ;;  %v1731_v8 = vld [vmem:[%s2703_s2 + $0x60] sm:$0xff]   ;;  %939 = vmatprep.mubr.bf16.mxu1 %v2016_v0 }
  0x40   : > { %1610 = vmatprep.subr.bf16.mxu0 %v1725_v2  ;;  %s2731_s28 = smov (!%p371_p11, %s1514_s28), 31  ;;  %v1730_v7 = vld [vmem:[%s2703_s2 + $0x18] sm:$0xff]   ;;  %v1732_v9 = vld [vmem:[%s2703_s2 + $0x20] sm:$0xff]   ;;  %v1733_v10 = vld [vmem:[%s2703_s2 + $0x68] sm:$0xff]  }
  0x41   : > { %s1605_s26 = sshll.u32 %s2731_s28, 3  ;;  %v1734_v14 = vld [vmem:[%s2703_s2 + $0x28] sm:$0xff]   ;;  %v1735_v15 = vld [vmem:[%s2703_s2 + $0x70] sm:$0xff]   ;;  %v1737_v17 = vld [vmem:[%s2703_s2 + $0x78] sm:$0xff]   ;;  %s1949_s28 = sshll.u32 %s2017_s16, 4  ;;  %s1950_s28 = int_to_ptr.vmem [resolvable:$false] %s1949_s28 }
  0x42   : > { %s2217_s14 = scalar_lea.vmem %s2701_s0, %s1605_s26  ;;  %v1736_v16 = vld [vmem:[%s2703_s2 + $0x30] sm:$0xff]   ;;  %v1738_v18 = vld [vmem:[%s2703_s2 + $0x38] sm:$0xff]   ;;  %v1755_v23 = vld [vmem:[%s2708_s7 + $0x4] ss:$8 sps:$4 sm:$0xff]   ;;  %s2721_s26 = sshll.u32 %s2174_s29, 8 }
  0x43   : > { %1611 = vmatpush3.bf16.msra.mxu0 %v1726_v3  ;;  %v2226_v11 = vld [vmem:[%s2217_s14] sm:$0xff]  ;;  %v2229_v12 = vld [vmem:[%s2217_s14 + $0x8] sm:$0xff]  ;;  %v2249_v19 = vld [vmem:[%s2217_s14 + $0x10] sm:$0xff]  ;;  %907 = vmatprep.subr.bf16.mxu1 %v1755_v23  ;;  %s2506_s23 = scalar_lea.vmem [#allocation5], %s2721_s26  ;;  %s1951_s17 = scalar_lea.vmem %s1950_s28, 8192 }
  0x44   : > { %1612 = vmatprep.subr.bf16.mxu0 %v1727_v4  ;;  %v1518_v13 = vcombine.high %v2226_v11, %v2229_v12  ;;  %v2252_v20 = vld [vmem:[%s2217_s14 + $0x18] sm:$0xff]  ;;  %v1517_v21 = vcombine.low %v2226_v11, %v2229_v12  ;;  %v1757_v24 = vld [vmem:[%s2708_s7] ss:$8 sps:$4 sm:$0xff]   ;;  %v1761_v29 = vld [vmem:[%s2708_s7 + $0x24] ss:$8 sps:$4 sm:$0xff]  }
  0x45   : > { %v1520_v22 = vcombine.high %v2249_v19, %v2252_v20  ;;  %v2265_v25 = vld [vmem:[%s2217_s14 + $0x20] sm:$0xff]  ;;  %v1758_v26 = vld [vmem:[%s2708_s7 + $0x14] ss:$8 sps:$4 sm:$0xff]   ;;  %v2271_v27 = vld [vmem:[%s2217_s14 + $0x28] sm:$0xff]  ;;  %908 = vmatpush1.bf16.msra.mxu1 %v1757_v24  ;;  %v1519_v30 = vcombine.low %v2249_v19, %v2252_v20 }
  0x46   : > { %636 = vmatprep.mubr.bf16.mxu0 %v1518_v13  ;;  %v1760_v28 = vld [vmem:[%s2708_s7 + $0x10] ss:$8 sps:$4 sm:$0xff]   ;;  %909 = vmatprep.subr.bf16.mxu1 %v1758_v26  ;;  %v1763_v31 = vld [vmem:[%s2708_s7 + $0x20] ss:$8 sps:$4 sm:$0xff]   ;;  %v1522_v32 = vcombine.high %v2265_v25, %v2271_v27  ;;  %v1764_v33 = vld [vmem:[%s2708_s7 + $0x34] ss:$8 sps:$4 sm:$0xff]   ;;  %v1521_v38 = vcombine.low %v2265_v25, %v2271_v27 }
  0x47   : > { %1613 = vmatpush3.bf16.msra.mxu0 %v1728_v5  ;;  %v1766_v34 = vld [vmem:[%s2708_s7 + $0x30] ss:$8 sps:$4 sm:$0xff]   ;;  %v1767_v37 = vld [vmem:[%s2708_s7 + $0x44] ss:$8 sps:$4 sm:$0xff]   ;;  %v1769_v40 = vld [vmem:[%s2708_s7 + $0x40] ss:$8 sps:$4 sm:$0xff]  }
  0x48   : > { %1614 = vmatprep.subr.bf16.mxu0 %v1729_v6  ;;  %v2293_v35 = vld [vmem:[%s2217_s14 + $0x30] sm:$0xff]  ;;  %v2296_v36 = vld [vmem:[%s2217_s14 + $0x38] sm:$0xff]  ;;  %v2309_v41 = vld [vmem:[%s2217_s14 + $0x40] sm:$0xff] }
  0x49   : > { %910 = vmatpush1.bf16.msra.mxu1 %v1760_v28  ;;  %v1524_v39 = vcombine.high %v2293_v35, %v2296_v36  ;;  %v2312_v42 = vld [vmem:[%s2217_s14 + $0x48] sm:$0xff]  ;;  %v1523_v43 = vcombine.low %v2293_v35, %v2296_v36  ;;  %v390_v45 = vld [vmem:[%s2217_s14 + $0x50] sm:$0xff]  ;;  %v391_v46 = vld [vmem:[%s2217_s14 + $0x58] sm:$0xff] }
  0x4a   : > { %911 = vmatprep.subr.bf16.mxu1 %v1761_v29  ;;  %v1526_v44 = vcombine.high %v2309_v41, %v2312_v42  ;;  %v1525_v47 = vcombine.low %v2309_v41, %v2312_v42  ;;  %v1528_v48 = vcombine.high %v390_v45, %v391_v46  ;;  %v392_v49 = vld [vmem:[%s2217_s14 + $0x60] sm:$0xff]  ;;  %v393_v50 = vld [vmem:[%s2217_s14 + $0x68] sm:$0xff]  ;;  %v1527_v51 = vcombine.low %v390_v45, %v391_v46  ;;  %v394_v53 = vld [vmem:[%s2217_s14 + $0x70] sm:$0xff] }
  0x4b   : > { %1615 = vmatpush3.bf16.msra.mxu0 %v1730_v7  ;;  %v1530_v52 = vcombine.high %v392_v49, %v393_v50  ;;  %v395_v54 = vld [vmem:[%s2217_s14 + $0x78] sm:$0xff]  ;;  %v1529_v55 = vcombine.low %v392_v49, %v393_v50  ;;  %v1773_v60 = vld [vmem:[%s2708_s7 + $0x64] ss:$8 sps:$4 sm:$0xff]   ;;  %v1775_v61 = vld [vmem:[%s2708_s7 + $0x60] ss:$8 sps:$4 sm:$0xff]  }
  0x4c   : > { %1616 = vmatprep.subr.bf16.mxu0 %v1731_v8  ;;  %v1532_v56 = vcombine.high %v394_v53, %v395_v54  ;;  %v1531_v57 = vcombine.low %v394_v53, %v395_v54  ;;  %v1770_v58 = vld [vmem:[%s2708_s7 + $0x54] ss:$8 sps:$4 sm:$0xff]   ;;  %v1772_v59 = vld [vmem:[%s2708_s7 + $0x50] ss:$8 sps:$4 sm:$0xff]   ;;  %v701_v1 = vld [vmem:[%s2704_s3] sm:$0xff] }
  0x4d   : > { %912 = vmatpush1.bf16.msra.mxu1 %v1763_v31  ;;  %v1776_v62 = vld [vmem:[%s2708_s7 + $0x74] ss:$8 sps:$4 sm:$0xff]   ;;  %v1778_v63 = vld [vmem:[%s2708_s7 + $0x70] ss:$8 sps:$4 sm:$0xff]   ;;  %v702_v2 = vld [vmem:[%s2704_s3 + $0x8] sm:$0xff] }
  0x4e   : > { %913 = vmatprep.subr.bf16.mxu1 %v1764_v33  ;;  %v703_v3 = vadd.f32 %v702_v2, %v701_v1  ;;  %v711_v4 = vld [vmem:[%s2705_s4] sm:$0xff]  ;;  %v712_v5 = vld [vmem:[%s2705_s4 + $0x8] sm:$0xff]  ;;  %v732_v33 = vlaneseq }
  0x4f   : > { %1617 = vmatpush3.bf16.msra.mxu0 %v1732_v9  ;;  %v713_v7 = vadd.f32 %v712_v5, %v711_v4 }
  0x50   : > { %1618 = vmatprep.subr.bf16.mxu0 %v1733_v10  ;;  %v704_v6 = vrot.slane %v703_v3, 4 }
  0x51   : > { %914 = vmatpush1.bf16.msra.mxu1 %v1766_v34  ;;  %v714_v9 = vrot.slane %v713_v7, 4 }
  0x52   : > { %915 = vmatprep.subr.bf16.mxu1 %v1767_v37  ;;  %v705_v8 = vadd.f32 %v704_v6, %v703_v3  ;;  %v2360_v37 = vshrl.u32 %v732_v33, 7 }
  0x53   : > { %1619 = vmatpush3.bf16.msra.mxu0 %v1734_v14  ;;  %v715_v13 = vadd.f32 %v714_v9, %v713_v7 }
  0x54   : > { %1620 = vmatprep.subr.bf16.mxu0 %v1735_v15  ;;  %v706_v10 = vrot.slane %v705_v8, 2 }
  0x55   : > { %916 = vmatpush1.bf16.msra.mxu1 %v1769_v40  ;;  %v716_v15 = vrot.slane %v715_v13, 2  ;;  %v2366_v40 = vsub.s32 0, %v2360_v37 }
  0x56   : > { %917 = vmatprep.subr.bf16.mxu1 %v1770_v58  ;;  %v707_v14 = vadd.f32 %v706_v10, %v705_v8 }
  0x57   : > { %1621 = vmatpush3.bf16.msra.mxu0 %v1736_v16 }
  0x58   : > { %1622 = vmatprep.subr.bf16.mxu0 %v1737_v17  ;;  %v708_v16 = vrot.slane %v707_v14, 1  ;;  %v717_v17 = vadd.f32 %v716_v15, %v715_v13 }
  0x59   : > { %918 = vmatpush1.bf16.msra.mxu1 %v1772_v59 }
  0x5a   : > { %919 = vmatprep.subr.bf16.mxu1 %v1773_v60 }
  0x5b   : > { %1623 = vmatpush3.bf16.msra.mxu0 %v1738_v18  ;;  %v709_v18 = vadd.f32 %v708_v16, %v707_v14 }
  0x5d   : > { %920 = vmatpush1.bf16.msra.mxu1 %v1775_v61 }
  0x5e   : > { %637 = vmatmul.mubr.bf16.vlgmr.msra.gmra.mrb[0].mxu0 %v1517_v21  ;;  %921 = vmatprep.subr.bf16.mxu1 %v1776_v62  ;;  %v718_v21 = vrot.slane %v717_v17, 1 }
  0x5f   : > { %644 = vmatprep.mubr.bf16.mxu0 %v1520_v22  ;;  %v710_v22 = vmul.f32 0.00048828125, %v709_v18 }
  0x60   : > { %v719_v23 = vadd.f32 %v718_v21, %v717_v17 }
  0x61   : > { %922 = vmatpush1.bf16.msra.mxu1 %v1778_v63  ;;  %v721_v26 = vmul.f32 %v710_v22, %v710_v22 }
  0x62   : > { %v720_v24 = vmul.f32 0.00048828125, %v719_v23 }
  0x64   : > { %v722_v28 = vsub.f32 %v720_v24, %v721_v26 }
  0x66   : > { %645 = vmatmul.mubr.bf16.gmra.mrb[4].mxu0 %v1519_v30  ;;  %v723_v29 = vmax.f32 %v722_v28, 0.0 }
  0x67   : > { %652 = vmatprep.mubr.bf16.mxu0 %v1522_v32  ;;  %v724_v32 = vld [vmem:[%s2706_s5] sm:$0x1] }
  0x68   : > { %v725_v30 = vadd.f32 1e-05, %v723_v29 }
  0x6a   : > { %1779 = vrsqrt.f32 %v725_v30 }
  0x6e   : > { %653 = vmatmul.mubr.bf16.gmra.mrb[8].mxu0 %v1521_v38 }
  0x6f   : > { %660 = vmatprep.mubr.bf16.mxu0 %v1524_v39  ;;  %v728_v39 = vld [vmem:[%s2707_s6] sm:$0x1] }
  0x74   : > { %v1780_v31 = vpop.eup %1779 }
  0x75   : > { %v727_v34 = vmul.f32 %v1780_v31, %v724_v32 }
  0x76   : > { %661 = vmatmul.mubr.bf16.gmra.mrb[12].mxu0 %v1523_v43 }
  0x77   : > { %668 = vmatprep.mubr.bf16.mxu0 %v1526_v44  ;;  %v729_v38 = vmul.f32 %v727_v34, %v710_v22  ;;  %v2369_v45 = vrot.slane %v727_v34, %v2366_v40 }
  0x79   : > { %v730_v43 = vsub.f32 %v728_v39, %v729_v38 }
  0x7e   : > { %669 = vmatmul.mubr.bf16.gmra.mrb[16].mxu0 %v1525_v47 }
  0x7f   : > { %676 = vmatprep.mubr.bf16.mxu0 %v1528_v48  ;;  %v2372_v48 = vrot.slane %v730_v43, %v2366_v40 }
  0x86   : > { %677 = vmatmul.mubr.bf16.gmra.mrb[20].mxu0 %v1527_v51 }
  0x87   : > { %684 = vmatprep.mubr.bf16.mxu0 %v1530_v52 }
  0x8e   : > { %685 = vmatmul.mubr.bf16.gmra.mrb[24].mxu0 %v1529_v55 }
  0x8f   : > { %692 = vmatprep.mubr.bf16.mxu0 %v1532_v56 }
  0x96   : > { %693 = vmatmul.mubr.bf16.gmra.mrb[28].mxu0 %v1531_v57 }
 0x131   : > { %v1624_v44 = vpop.f32.mrb[0].mxu0 }
 0x132   : > { %v1625_v46 = vpop.f32.mrb[1].mxu0 }
 0x133   : > { %v1626_v47 = vadd.f32 %v1625_v46, %v1624_v44  ;;  %v1627_v49 = vpop.f32.mrb[2].mxu0 }
 0x134   : > { %v1628_v50 = vpop.f32.mrb[3].mxu0 }
 0x135   : > { %v737_v51 = vmul.f32 %v1626_v47, %v2369_v45  ;;  %v1629_v52 = vadd.f32 %v1628_v50, %v1627_v49 }
 0x137   : > { %v759_v53 = vadd.f32 %v2372_v48, %v737_v51  ;;  %v738_v54 = vmul.f32 %v1629_v52, %v2369_v45 }
 0x139   : > { %v760_v55 = vadd.f32 %v2372_v48, %v738_v54  ;;  %v1630_v56 = vpop.f32.mrb[4].mxu0  ;;  %v775_v58 = vmax.f32 %v759_v53, 0.0 }
 0x13a   : > { %v1631_v57 = vpop.f32.mrb[5].mxu0 }
 0x13b   : > { %v776_v59 = vmax.f32 %v760_v55, 0.0  ;;  %v1632_v60 = vadd.f32 %v1631_v57, %v1630_v56  ;;  %v1633_v61 = vpop.f32.mrb[6].mxu0 }
 0x13c   : > { %v1634_v62 = vpop.f32.mrb[7].mxu0 }
 0x13d   : > { %v739_v63 = vmul.f32 %v1632_v60, %v2369_v45  ;;  %v1635_v1 = vadd.f32 %v1634_v62, %v1633_v61  ;;  %v791_v2 = vpack.c.bf16 %v776_v59, %v775_v58 }
 0x13f   : > { %v761_v3 = vadd.f32 %v2372_v48, %v739_v63  ;;  %v740_v4 = vmul.f32 %v1635_v1, %v2369_v45  ;;  %940 = vmatmul.mubr.bf16.vlgmr.msra.gmra.mrb[0].mxu1 %v791_v2 }
 0x140   : > { %949 = vmatprep.mubr.bf16.mxu1 %v2016_v0 }
 0x141   : > { %v762_v5 = vadd.f32 %v2372_v48, %v740_v4  ;;  %v1636_v6 = vpop.f32.mrb[8].mxu0  ;;  %v777_v8 = vmax.f32 %v761_v3, 0.0 }
 0x142   : > { %v1637_v7 = vpop.f32.mrb[9].mxu0 }
 0x143   : > { %v778_v9 = vmax.f32 %v762_v5, 0.0  ;;  %v1638_v10 = vadd.f32 %v1637_v7, %v1636_v6  ;;  %v1639_v13 = vpop.f32.mrb[10].mxu0 }
 0x144   : > { %v1640_v14 = vpop.f32.mrb[11].mxu0 }
 0x145   : > { %v741_v15 = vmul.f32 %v1638_v10, %v2369_v45  ;;  %v1641_v16 = vadd.f32 %v1640_v14, %v1639_v13  ;;  %v792_v17 = vpack.c.bf16 %v778_v9, %v777_v8 }
 0x147   : > { %v763_v18 = vadd.f32 %v2372_v48, %v741_v15  ;;  %v742_v21 = vmul.f32 %v1641_v16, %v2369_v45  ;;  %950 = vmatmul.mubr.bf16.gmra.mrb[4].mxu1 %v792_v17 }
 0x148   : > { %959 = vmatprep.mubr.bf16.mxu1 %v2016_v0 }
 0x149   : > { %v764_v22 = vadd.f32 %v2372_v48, %v742_v21  ;;  %v1642_v23 = vpop.f32.mrb[12].mxu0  ;;  %v779_v26 = vmax.f32 %v763_v18, 0.0 }
 0x14a   : > { %v1643_v24 = vpop.f32.mrb[13].mxu0 }
 0x14b   : > { %v780_v28 = vmax.f32 %v764_v22, 0.0  ;;  %v1644_v29 = vadd.f32 %v1643_v24, %v1642_v23  ;;  %v1645_v30 = vpop.f32.mrb[14].mxu0 }
 0x14c   : > { %v1646_v31 = vpop.f32.mrb[15].mxu0 }
 0x14d   : > { %v743_v32 = vmul.f32 %v1644_v29, %v2369_v45  ;;  %v1647_v33 = vadd.f32 %v1646_v31, %v1645_v30  ;;  %v793_v34 = vpack.c.bf16 %v780_v28, %v779_v26 }
 0x14f   : > { %v765_v38 = vadd.f32 %v2372_v48, %v743_v32  ;;  %v744_v39 = vmul.f32 %v1647_v33, %v2369_v45  ;;  %960 = vmatmul.mubr.bf16.gmra.mrb[8].mxu1 %v793_v34 }
 0x150   : > { %969 = vmatprep.mubr.bf16.mxu1 %v2016_v0 }
 0x151   : > { %v766_v43 = vadd.f32 %v2372_v48, %v744_v39  ;;  %v1648_v44 = vpop.f32.mrb[16].mxu0  ;;  %v781_v47 = vmax.f32 %v765_v38, 0.0 }
 0x152   : > { %v1649_v46 = vpop.f32.mrb[17].mxu0 }
 0x153   : > { %v782_v49 = vmax.f32 %v766_v43, 0.0  ;;  %v1650_v50 = vadd.f32 %v1649_v46, %v1648_v44  ;;  %v1651_v51 = vpop.f32.mrb[18].mxu0 }
 0x154   : > { %v1652_v52 = vpop.f32.mrb[19].mxu0 }
 0x155   : > { %v745_v53 = vmul.f32 %v1650_v50, %v2369_v45  ;;  %v1653_v54 = vadd.f32 %v1652_v52, %v1651_v51  ;;  %v794_v55 = vpack.c.bf16 %v782_v49, %v781_v47  ;;  %v815_v52 = vld [vmem:[%s2709_s8] sm:$0x3] }
 0x157   : > { %v767_v56 = vadd.f32 %v2372_v48, %v745_v53  ;;  %v746_v57 = vmul.f32 %v1653_v54, %v2369_v45  ;;  %970 = vmatmul.mubr.bf16.gmra.mrb[12].mxu1 %v794_v55  ;;  %v823_v53 = vsub.s32 1, %v2360_v37  ;;  %v2418_v54 = vrot.slane %v815_v52, %v2366_v40 }
 0x158   : > { %979 = vmatprep.mubr.bf16.mxu1 %v2016_v0 }
 0x159   : > { %v768_v58 = vadd.f32 %v2372_v48, %v746_v57  ;;  %v1654_v59 = vpop.f32.mrb[20].mxu0  ;;  %v783_v61 = vmax.f32 %v767_v56, 0.0  ;;  %v2420_v55 = vrot.slane %v815_v52, %v823_v53 }
 0x15a   : > { %v1655_v60 = vpop.f32.mrb[21].mxu0 }
 0x15b   : > { %v784_v62 = vmax.f32 %v768_v58, 0.0  ;;  %v1656_v63 = vadd.f32 %v1655_v60, %v1654_v59  ;;  %v1657_v1 = vpop.f32.mrb[22].mxu0 }
 0x15c   : > { %v1658_v2 = vpop.f32.mrb[23].mxu0 }
 0x15d   : > { %v747_v3 = vmul.f32 %v1656_v63, %v2369_v45  ;;  %v1659_v4 = vadd.f32 %v1658_v2, %v1657_v1  ;;  %v795_v5 = vpack.c.bf16 %v784_v62, %v783_v61 }
 0x15f   : > { %v769_v6 = vadd.f32 %v2372_v48, %v747_v3  ;;  %v748_v7 = vmul.f32 %v1659_v4, %v2369_v45  ;;  %980 = vmatmul.mubr.bf16.gmra.mrb[16].mxu1 %v795_v5 }
 0x160   : > { %989 = vmatprep.mubr.bf16.mxu1 %v2016_v0 }
 0x161   : > { %v770_v8 = vadd.f32 %v2372_v48, %v748_v7  ;;  %v1660_v9 = vpop.f32.mrb[24].mxu0  ;;  %v785_v13 = vmax.f32 %v769_v6, 0.0 }
 0x162   : > { %v1661_v10 = vpop.f32.mrb[25].mxu0 }
 0x163   : > { %v786_v14 = vmax.f32 %v770_v8, 0.0  ;;  %v1662_v15 = vadd.f32 %v1661_v10, %v1660_v9  ;;  %v1663_v16 = vpop.f32.mrb[26].mxu0 }
 0x164   : > { %v1664_v17 = vpop.f32.mrb[27].mxu0 }
 0x165   : > { %v749_v18 = vmul.f32 %v1662_v15, %v2369_v45  ;;  %v1665_v21 = vadd.f32 %v1664_v17, %v1663_v16  ;;  %v796_v22 = vpack.c.bf16 %v786_v14, %v785_v13  ;;  %v1244_v15 = vunpack.c.l.bf16 %v2226_v11 }
 0x166   : > { %v1245_v17 = vunpack.c.h.bf16 %v2226_v11  ;;  %v2437_v11 = vld [vmem:[%s2180_s19] sm:$0xff] }
 0x167   : > { %v771_v23 = vadd.f32 %v2372_v48, %v749_v18  ;;  %v750_v24 = vmul.f32 %v1665_v21, %v2369_v45  ;;  %990 = vmatmul.mubr.bf16.gmra.mrb[20].mxu1 %v796_v22  ;;  %v1246_v18 = vunpack.c.l.bf16 %v2229_v12  ;;  %v1276_v53 = vsub.f32 %v1244_v15, %v2437_v11 }
 0x168   : > { %999 = vmatprep.mubr.bf16.mxu1 %v2016_v0 }
 0x169   : > { %v772_v26 = vadd.f32 %v2372_v48, %v750_v24  ;;  %v1666_v28 = vpop.f32.mrb[28].mxu0  ;;  %v787_v30 = vmax.f32 %v771_v23, 0.0  ;;  %v1247_v24 = vunpack.c.h.bf16 %v2229_v12  ;;  %v2442_v12 = vld [vmem:[%s2180_s19 + $0x8] sm:$0xff] }
 0x16a   : > { %v1667_v29 = vpop.f32.mrb[29].mxu0 }
 0x16b   : > { %v788_v31 = vmax.f32 %v772_v26, 0.0  ;;  %v1668_v32 = vadd.f32 %v1667_v29, %v1666_v28  ;;  %v1669_v33 = vpop.f32.mrb[30].mxu0  ;;  %v1248_v26 = vunpack.c.l.bf16 %v2249_v19 }
 0x16c   : > { %v1670_v34 = vpop.f32.mrb[31].mxu0 }
 0x16d   : > { %v751_v38 = vmul.f32 %v1668_v32, %v2369_v45  ;;  %v1671_v39 = vadd.f32 %v1670_v34, %v1669_v33  ;;  %v797_v43 = vpack.c.bf16 %v788_v31, %v787_v30  ;;  %v1249_v32 = vunpack.c.h.bf16 %v2249_v19  ;;  %v2452_v19 = vld [vmem:[%s2180_s19 + $0x20] sm:$0xff] }
 0x16f   : > { %v773_v44 = vadd.f32 %v2372_v48, %v751_v38  ;;  %v752_v46 = vmul.f32 %v1671_v39, %v2369_v45  ;;  %1000 = vmatmul.mubr.bf16.gmra.mrb[24].mxu1 %v797_v43  ;;  %v2445_v39 = vld [vmem:[%s2180_s19 + $0x10] sm:$0xff] }
 0x170   : > { %1009 = vmatprep.mubr.bf16.mxu1 %v2016_v0 }
 0x171   : > { %v774_v47 = vadd.f32 %v2372_v48, %v752_v46  ;;  %v789_v49 = vmax.f32 %v773_v44, 0.0 }
 0x173   : > { %v790_v50 = vmax.f32 %v774_v47, 0.0 }
 0x175   : > { %v798_v51 = vpack.c.bf16 %v790_v50, %v789_v49  ;;  %v2449_v49 = vld [vmem:[%s2180_s19 + $0x18] sm:$0xff]  ;;  %v1250_v50 = vunpack.c.l.bf16 %v2252_v20 }
 0x177   : > { %1010 = vmatmul.mubr.bf16.gmra.mrb[28].mxu1 %v798_v51 }
 0x212   : > { %v941_v45 = vpop.f32.mrb[0].mxu1 }
 0x213   : > { %v942_v0 = vadd.f32 %v941_v45, %v2418_v54  ;;  %v943_v56 = vpop.f32.mrb[1].mxu1  ;;  %v2458_v45 = vld [vmem:[%s2180_s19 + $0x28] sm:$0xff] }
 0x214   : > { %v944_v48 = vadd.f32 %v943_v56, %v2420_v55  ;;  %v945_v57 = vpop.f32.mrb[2].mxu1 }
 0x215   : > { %v1565_v58 = vmul.f32 -1.442695, %v942_v0  ;;  %v946_v59 = vadd.f32 %v945_v57, %v2418_v54  ;;  %v947_v60 = vpop.f32.mrb[3].mxu1  ;;  %v2461_v0 = vld [vmem:[%s2180_s19 + $0x30] sm:$0xff]  ;;  %v1278_v57 = vsub.f32 %v1246_v18, %v2445_v39 }
 0x216   : > { %v1566_v61 = vmul.f32 -1.442695, %v944_v48  ;;  %v948_v62 = vadd.f32 %v947_v60, %v2420_v55  ;;  %v1277_v48 = vsub.f32 %v1245_v17, %v2442_v12  ;;  %v1279_v60 = vsub.f32 %v1247_v24, %v2449_v49 }
 0x217   : > { %1781 = vpow2.f32 %v1565_v58  ;;  %v1567_v37 = vmul.f32 -1.442695, %v946_v59 }
 0x218   : > { %1783 = vpow2.f32 %v1566_v61  ;;  %v1568_v40 = vmul.f32 -1.442695, %v948_v62  ;;  %v1251_v61 = vunpack.c.h.bf16 %v2252_v20  ;;  %v2468_v62 = vsub.f32 %v1248_v26, %v2452_v19 }
 0x219   : > { %1785 = vpow2.f32 %v1567_v37 }
 0x21a   : > { %1787 = vpow2.f32 %v1568_v40  ;;  %v951_v63 = vpop.f32.mrb[4].mxu1  ;;  %v2471_v40 = vsub.f32 %v1249_v32, %v2458_v45 }
 0x21b   : > { %v952_v1 = vadd.f32 %v951_v63, %v2418_v54  ;;  %v953_v2 = vpop.f32.mrb[5].mxu1  ;;  %v2474_v63 = vsub.f32 %v1250_v50, %v2461_v0 }
 0x21c   : > { %v954_v3 = vadd.f32 %v953_v2, %v2420_v55  ;;  %v955_v4 = vpop.f32.mrb[6].mxu1 }
 0x21d   : > { %v1569_v5 = vmul.f32 -1.442695, %v952_v1  ;;  %v956_v6 = vadd.f32 %v955_v4, %v2418_v54  ;;  %v957_v7 = vpop.f32.mrb[7].mxu1  ;;  %v2477_v4 = vld [vmem:[%s2180_s19 + $0x38] sm:$0xff] }
 0x21e   : > { %v1570_v8 = vmul.f32 -1.442695, %v954_v3  ;;  %v958_v9 = vadd.f32 %v957_v7, %v2420_v55 }
 0x21f   : > { %1789 = vpow2.f32 %v1569_v5  ;;  %v1571_v10 = vmul.f32 -1.442695, %v956_v6  ;;  %v1252_v5 = vunpack.c.l.bf16 %v2265_v25 }
 0x220   : > { %1791 = vpow2.f32 %v1570_v8  ;;  %v1572_v13 = vmul.f32 -1.442695, %v958_v9  ;;  %v1253_v9 = vunpack.c.h.bf16 %v2265_v25 }
 0x221   : > { %v1782_v14 = vpop.eup %1781  ;;  %1793 = vpow2.f32 %v1571_v10 }
 0x222   : > { %v1784_v16 = vpop.eup %1783  ;;  %v1116_v21 = vadd.f32 1.0, %v1782_v14  ;;  %1795 = vpow2.f32 %v1572_v13  ;;  %v961_v22 = vpop.f32.mrb[8].mxu1 }
 0x223   : > { %v1786_v23 = vpop.eup %1785  ;;  %v1117_v28 = vadd.f32 1.0, %v1784_v16  ;;  %v962_v29 = vadd.f32 %v961_v22, %v2418_v54  ;;  %v963_v30 = vpop.f32.mrb[9].mxu1  ;;  %v2485_v22 = vsub.f32 %v1251_v61, %v2477_v4 }
 0x224   : > { %v1788_v31 = vpop.eup %1787  ;;  %1797 = vrcp.f32 %v1116_v21  ;;  %v1118_v33 = vadd.f32 1.0, %v1786_v23  ;;  %v964_v34 = vadd.f32 %v963_v30, %v2420_v55  ;;  %v965_v38 = vpop.f32.mrb[10].mxu1  ;;  %v2488_v23 = vld [vmem:[%s2180_s19 + $0x40] sm:$0xff] }
 0x225   : > { %1799 = vrcp.f32 %v1117_v28  ;;  %v1119_v43 = vadd.f32 1.0, %v1788_v31  ;;  %v1573_v44 = vmul.f32 -1.442695, %v962_v29  ;;  %v966_v46 = vadd.f32 %v965_v38, %v2418_v54  ;;  %v967_v47 = vpop.f32.mrb[11].mxu1  ;;  %v2492_v28 = vld [vmem:[%s2180_s19 + $0x48] sm:$0xff] }
 0x226   : > { %1801 = vrcp.f32 %v1118_v33  ;;  %v1574_v51 = vmul.f32 -1.442695, %v964_v34  ;;  %v968_v52 = vadd.f32 %v967_v47, %v2420_v55  ;;  %v1254_v29 = vunpack.c.l.bf16 %v2271_v27 }
 0x227   : > { %1803 = vrcp.f32 %v1119_v43  ;;  %v1575_v56 = vmul.f32 -1.442695, %v966_v46  ;;  %v1255_v33 = vunpack.c.h.bf16 %v2271_v27 }
 0x228   : > { %1805 = vpow2.f32 %v1573_v44  ;;  %v1576_v58 = vmul.f32 -1.442695, %v968_v52  ;;  %v2497_v44 = vsub.f32 %v1252_v5, %v2488_v23 }
 0x229   : > { %v1790_v59 = vpop.eup %1789  ;;  %1807 = vpow2.f32 %v1574_v51  ;;  %v2501_v51 = vsub.f32 %v1253_v9, %v2492_v28 }
 0x22a   : > { %v1792_v37 = vpop.eup %1791  ;;  %v1120_v1 = vadd.f32 1.0, %v1790_v59  ;;  %1809 = vpow2.f32 %v1575_v56  ;;  %v971_v2 = vpop.f32.mrb[12].mxu1  ;;  %v2512_v59 = vld [vmem:[%s2180_s19 + $0x50] sm:$0xff] }
 0x22b   : > { %v1794_v3 = vpop.eup %1793  ;;  %v1121_v20 = vadd.f32 1.0, %v1792_v37  ;;  %1811 = vpow2.f32 %v1576_v58  ;;  %v972_v6 = vadd.f32 %v971_v2, %v2418_v54  ;;  %v973_v7 = vpop.f32.mrb[13].mxu1 }
 0x22c   : > { %v1796_v8 = vpop.eup %1795  ;;  %1813 = vrcp.f32 %v1120_v1  ;;  %v1122_v10 = vadd.f32 1.0, %v1794_v3  ;;  %v974_v13 = vadd.f32 %v973_v7, %v2420_v55  ;;  %v975_v14 = vpop.f32.mrb[14].mxu1 }
 0x22d   : > { %1815 = vrcp.f32 %v1121_v20  ;;  %v1123_v15 = vadd.f32 1.0, %v1796_v8  ;;  %v1577_v16 = vmul.f32 -1.442695, %v972_v6  ;;  %v976_v17 = vadd.f32 %v975_v14, %v2418_v54  ;;  %v977_v18 = vpop.f32.mrb[15].mxu1 }
 0x22e   : > { %v1798_v21 = vpop.eup %1797  ;;  %1817 = vrcp.f32 %v1122_v10  ;;  %v1578_v25 = vmul.f32 -1.442695, %v974_v13  ;;  %v978_v24 = vadd.f32 %v977_v18, %v2420_v55  ;;  %v2526_v14 = vsub.f32 %v1254_v29, %v2512_v59 }
 0x22f   : > { %v1800_v26 = vpop.eup %1799  ;;  %v1308_v30 = vmul.f32 %v1798_v21, %v1276_v53  ;;  %1819 = vrcp.f32 %v1123_v15  ;;  %v1579_v31 = vmul.f32 -1.442695, %v976_v17 }
 0x230   : > { %v1802_v32 = vpop.eup %1801  ;;  %v1309_v34 = vmul.f32 %v1800_v26, %v1277_v48  ;;  %1821 = vpow2.f32 %v1577_v16  ;;  %v1580_v38 = vmul.f32 -1.442695, %v978_v24  ;;  %v1257_v26 = vunpack.c.h.bf16 %v2293_v35 }
 0x231   : > { %v1804_v43 = vpop.eup %1803  ;;  %v1340_v46 = vadd.f32 %v1308_v30, %v2437_v11  ;;  %v1310_v47 = vmul.f32 %v1802_v32, %v1278_v57  ;;  %1823 = vpow2.f32 %v1578_v25 }
 0x232   : > { %v1806_v50 = vpop.eup %1805  ;;  %v1341_v52 = vadd.f32 %v1309_v34, %v2442_v12  ;;  %v1311_v27 = vmul.f32 %v1804_v43, %v1279_v60  ;;  %1825 = vpow2.f32 %v1579_v31  ;;  %v981_v53 = vpop.f32.mrb[16].mxu1  ;;  %v1256_v60 = vunpack.c.l.bf16 %v2293_v35 }
 0x233   : > { %v1808_v56 = vpop.eup %1807  ;;  %1372 = vst [vmem:[%s2506_s23] sm:$0xff] %v1340_v46  ;;  %v1342_v11 = vadd.f32 %v1310_v47, %v2445_v39  ;;  %v1124_v48 = vadd.f32 1.0, %v1806_v50  ;;  %1827 = vpow2.f32 %v1580_v38  ;;  %v982_v57 = vadd.f32 %v981_v53, %v2418_v54  ;;  %v983_v58 = vpop.f32.mrb[17].mxu1  ;;  %v2519_v39 = vld [vmem:[%s2180_s19 + $0x58] sm:$0xff]  ;;  %v2543_v47 = vld [vmem:[%s2180_s19 + $0x60] sm:$0xff] }
 0x234   : > { %v1810_v12 = vpop.eup %1809  ;;  %1373 = vst [vmem:[%s2506_s23 + $0x8] sm:$0xff] %v1341_v52  ;;  %v1343_v61 = vadd.f32 %v1311_v27, %v2449_v49  ;;  %v1125_v37 = vadd.f32 1.0, %v1808_v56  ;;  %v984_v1 = vadd.f32 %v983_v58, %v2420_v55  ;;  %v985_v2 = vpop.f32.mrb[18].mxu1  ;;  %v2530_v18 = vsub.f32 %v1255_v33, %v2519_v39 }
 0x235   : > { %v1812_v3 = vpop.eup %1811  ;;  %1374 = vst [vmem:[%s2506_s23 + $0x10] sm:$0xff] %v1342_v11  ;;  %1829 = vrcp.f32 %v1124_v48  ;;  %v1126_v5 = vadd.f32 1.0, %v1810_v12  ;;  %v1581_v20 = vmul.f32 -1.442695, %v982_v57  ;;  %v986_v6 = vadd.f32 %v985_v2, %v2418_v54  ;;  %v987_v7 = vpop.f32.mrb[19].mxu1  ;;  %v2554_v57 = vld [vmem:[%s2180_s19 + $0x70] sm:$0xff] }
 0x236   : > { %v1814_v8 = vpop.eup %1813  ;;  %1375 = vst [vmem:[%s2506_s23 + $0x18] sm:$0xff] %v1343_v61  ;;  %1831 = vrcp.f32 %v1125_v37  ;;  %v1127_v9 = vadd.f32 1.0, %v1812_v3  ;;  %v1582_v10 = vmul.f32 -1.442695, %v984_v1  ;;  %v988_v49 = vadd.f32 %v987_v7, %v2420_v55 }
 0x237   : > { %v1816_v13 = vpop.eup %1815  ;;  %v1312_v15 = vmul.f32 %v1814_v8, %v2468_v62  ;;  %1833 = vrcp.f32 %v1126_v5  ;;  %v1583_v16 = vmul.f32 -1.442695, %v986_v6  ;;  %v1258_v31 = vunpack.c.l.bf16 %v2296_v36 }
 0x238   : > { %v1818_v17 = vpop.eup %1817  ;;  %v1313_v21 = vmul.f32 %v1816_v13, %v2471_v40  ;;  %1835 = vrcp.f32 %v1127_v9  ;;  %v1584_v25 = vmul.f32 -1.442695, %v988_v49  ;;  %v1259_v37 = vunpack.c.h.bf16 %v2296_v36 }
 0x239   : > { %v1820_v24 = vpop.eup %1819  ;;  %v1344_v30 = vadd.f32 %v1312_v15, %v2452_v19  ;;  %v1314_v29 = vmul.f32 %v1818_v17, %v2474_v63  ;;  %1837 = vpow2.f32 %v1581_v20  ;;  %v1288_v1 = vsub.f32 %v1256_v60, %v2543_v47  ;;  %v2568_v60 = vld [vmem:[%s2180_s19 + $0x78] sm:$0xff] }
 0x23a   : > { %v1822_v62 = vpop.eup %1821  ;;  %v1345_v32 = vadd.f32 %v1313_v21, %v2458_v45  ;;  %v1315_v33 = vmul.f32 %v1820_v24, %v2485_v22  ;;  %1839 = vpow2.f32 %v1582_v10  ;;  %v991_v40 = vpop.f32.mrb[20].mxu1  ;;  %v1290_v8 = vsub.f32 %v1258_v31, %v2554_v57 }
 0x23b   : > { %v1824_v34 = vpop.eup %1823  ;;  %1376 = vst [vmem:[%s2506_s23 + $0x20] sm:$0xff] %v1344_v30  ;;  %v1346_v19 = vadd.f32 %v1314_v29, %v2461_v0  ;;  %v1128_v38 = vadd.f32 1.0, %v1822_v62  ;;  %1841 = vpow2.f32 %v1583_v16  ;;  %v992_v63 = vadd.f32 %v991_v40, %v2418_v54  ;;  %v993_v43 = vpop.f32.mrb[21].mxu1  ;;  %v2549_v0 = vld [vmem:[%s2180_s19 + $0x68] sm:$0xff] }
 0x23c   : > { %v1826_v46 = vpop.eup %1825  ;;  %1377 = vst [vmem:[%s2506_s23 + $0x28] sm:$0xff] %v1345_v32  ;;  %v1347_v45 = vadd.f32 %v1315_v33, %v2477_v4  ;;  %v1129_v22 = vadd.f32 1.0, %v1824_v34  ;;  %1843 = vpow2.f32 %v1584_v25  ;;  %v994_v50 = vadd.f32 %v993_v43, %v2420_v55  ;;  %v995_v52 = vpop.f32.mrb[22].mxu1  ;;  %v2584_v32 = vld [vmem:[%s2180_s19 + $0x80] sm:$0xff] }
 0x23d   : > { %v1828_v27 = vpop.eup %1827  ;;  %1378 = vst [vmem:[%s2506_s23 + $0x30] sm:$0xff] %v1346_v19  ;;  %1845 = vrcp.f32 %v1128_v38  ;;  %v1130_v53 = vadd.f32 1.0, %v1826_v46  ;;  %v1585_v56 = vmul.f32 -1.442695, %v992_v63  ;;  %v996_v11 = vadd.f32 %v995_v52, %v2418_v54  ;;  %v997_v48 = vpop.f32.mrb[23].mxu1  ;;  %v2589_v19 = vld [vmem:[%s2180_s19 + $0x88] sm:$0xff] }
 0x23e   : > { %1379 = vst [vmem:[%s2506_s23 + $0x38] sm:$0xff] %v1347_v45  ;;  %1847 = vrcp.f32 %v1129_v22  ;;  %v1131_v4 = vadd.f32 1.0, %v1828_v27  ;;  %v1586_v58 = vmul.f32 -1.442695, %v994_v50  ;;  %v998_v12 = vadd.f32 %v997_v48, %v2420_v55 }
 0x23f   : > { %v1830_v61 = vpop.eup %1829  ;;  %1849 = vrcp.f32 %v1130_v53  ;;  %v1587_v2 = vmul.f32 -1.442695, %v996_v11  ;;  %v1289_v5 = vsub.f32 %v1257_v26, %v2549_v0  ;;  %v1260_v9 = vunpack.c.l.bf16 %v2309_v41  ;;  %v2596_v11 = vld [vmem:[%s2180_s19 + $0x90] sm:$0xff] }
 0x240   : > { %v1832_v3 = vpop.eup %1831  ;;  %v1316_v20 = vmul.f32 %v1830_v61, %v2497_v44  ;;  %1851 = vrcp.f32 %v1131_v4  ;;  %v1588_v6 = vmul.f32 -1.442695, %v998_v12  ;;  %v1261_v10 = vunpack.c.h.bf16 %v2309_v41 }
 0x241   : > { %v1834_v7 = vpop.eup %1833  ;;  %v1317_v36 = vmul.f32 %v1832_v3, %v2501_v51  ;;  %1853 = vpow2.f32 %v1585_v56  ;;  %v1262_v38 = vunpack.c.l.bf16 %v2312_v42  ;;  %v1263_v46 = vunpack.c.h.bf16 %v2312_v42 }
 0x242   : > { %v1836_v35 = vpop.eup %1835  ;;  %v1348_v49 = vadd.f32 %v1316_v20, %v2488_v23  ;;  %v1318_v44 = vmul.f32 %v1834_v7, %v2526_v14  ;;  %1855 = vpow2.f32 %v1586_v58  ;;  %v1001_v13 = vpop.f32.mrb[24].mxu1  ;;  %v1292_v52 = vsub.f32 %v1260_v9, %v2584_v32 }
 0x243   : > { %v1838_v15 = vpop.eup %1837  ;;  %v1349_v16 = vadd.f32 %v1317_v36, %v2492_v28  ;;  %v1319_v17 = vmul.f32 %v1836_v35, %v2530_v18  ;;  %1857 = vpow2.f32 %v1587_v2  ;;  %v1002_v51 = vadd.f32 %v1001_v13, %v2418_v54  ;;  %v1003_v21 = vpop.f32.mrb[25].mxu1 }
 0x244   : > { %v1840_v25 = vpop.eup %1839  ;;  %1380 = vst [vmem:[%s2506_s23 + $0x40] sm:$0xff] %v1348_v49  ;;  %v1350_v41 = vadd.f32 %v1318_v44, %v2512_v59  ;;  %v1132_v23 = vadd.f32 1.0, %v1838_v15  ;;  %1859 = vpow2.f32 %v1588_v6  ;;  %v1004_v14 = vadd.f32 %v1003_v21, %v2420_v55  ;;  %v1005_v24 = vpop.f32.mrb[26].mxu1 }
 0x245   : > { %v1842_v26 = vpop.eup %1841  ;;  %v1291_v28 = vsub.f32 %v1259_v37, %v2568_v60  ;;  %1381 = vst [vmem:[%s2506_s23 + $0x48] sm:$0xff] %v1349_v16  ;;  %v1351_v18 = vadd.f32 %v1319_v17, %v2519_v39  ;;  %v1133_v30 = vadd.f32 1.0, %v1840_v25  ;;  %v1006_v29 = vadd.f32 %v1005_v24, %v2418_v54  ;;  %v1007_v62 = vpop.f32.mrb[27].mxu1  ;;  %v1909_v25 = vld [vmem:[%s2217_s14 + $0x50] sm:$0xff]  ;;  %v1232_v24 = vld [vmem:[%s2180_s19 + $0xa0] sm:$0xff] }
 0x246   : > { %v1844_v31 = vpop.eup %1843  ;;  %1382 = vst [vmem:[%s2506_s23 + $0x50] sm:$0xff] %v1350_v41  ;;  %1861 = vrcp.f32 %v1132_v23  ;;  %v1134_v59 = vadd.f32 1.0, %v1842_v26  ;;  %v1589_v33 = vmul.f32 -1.442695, %v1002_v51  ;;  %v1008_v40 = vadd.f32 %v1007_v62, %v2420_v55 }
 0x247   : > { %v1846_v34 = vpop.eup %1845  ;;  %1383 = vst [vmem:[%s2506_s23 + $0x58] sm:$0xff] %v1351_v18  ;;  %1863 = vrcp.f32 %v1133_v30  ;;  %v1135_v39 = vadd.f32 1.0, %v1844_v31  ;;  %v1590_v63 = vmul.f32 -1.442695, %v1004_v14  ;;  %v1591_v22 = vmul.f32 -1.442695, %v1006_v29 }
 0x248   : > { %v1848_v43 = vpop.eup %1847  ;;  %v1320_v45 = vmul.f32 %v1846_v34, %v1288_v1  ;;  %1865 = vrcp.f32 %v1134_v59  ;;  %v1592_v53 = vmul.f32 -1.442695, %v1008_v40  ;;  %v1293_v48 = vsub.f32 %v1261_v10, %v2589_v19  ;;  %v1233_v18 = vld [vmem:[%s2180_s19 + $0xa8] sm:$0xff]  ;;  %v1910_v30 = vld [vmem:[%s2217_s14 + $0x58] sm:$0xff] }
 0x249   : > { %v1850_v50 = vpop.eup %1849  ;;  %v1321_v27 = vmul.f32 %v1848_v43, %v1289_v5  ;;  %1867 = vrcp.f32 %v1135_v39  ;;  %v1264_v41 = vunpack.c.l.bf16 %v1909_v25  ;;  %v1265_v26 = vunpack.c.h.bf16 %v1909_v25 }
 0x24a   : > { %v1852_v56 = vpop.eup %1851  ;;  %v1352_v4 = vadd.f32 %v1320_v45, %v2543_v47  ;;  %v1322_v58 = vmul.f32 %v1850_v50, %v1290_v8  ;;  %1869 = vpow2.f32 %v1589_v33  ;;  %v1011_v42 = vpop.f32.mrb[28].mxu1  ;;  %v1231_v8 = vld [vmem:[%s2180_s19 + $0x98] sm:$0xff]  ;;  %v1266_v29 = vunpack.c.l.bf16 %v1910_v30  ;;  %v1234_v33 = vld [vmem:[%s2180_s19 + $0xb0] sm:$0xff] }
 0x24b   : > { %v1854_v12 = vpop.eup %1853  ;;  %v1353_v61 = vadd.f32 %v1321_v27, %v2549_v0  ;;  %v1323_v37 = vmul.f32 %v1852_v56, %v1291_v28  ;;  %1871 = vpow2.f32 %v1590_v63  ;;  %v1012_v1 = vadd.f32 %v1011_v42, %v2418_v54  ;;  %v1013_v2 = vpop.f32.mrb[29].mxu1  ;;  %v1235_v63 = vld [vmem:[%s2180_s19 + $0xb8] sm:$0xff] }
 0x24c   : > { %v1856_v3 = vpop.eup %1855  ;;  %1384 = vst [vmem:[%s2506_s23 + $0x60] sm:$0xff] %v1352_v4  ;;  %v1354_v5 = vadd.f32 %v1322_v58, %v2554_v57  ;;  %v1136_v20 = vadd.f32 1.0, %v1854_v12  ;;  %1873 = vpow2.f32 %v1591_v22  ;;  %v1014_v47 = vadd.f32 %v1013_v2, %v2420_v55  ;;  %v1015_v6 = vpop.f32.mrb[30].mxu1  ;;  %v1911_v12 = vld [vmem:[%s2217_s14 + $0x60] sm:$0xff] }
 0x24d   : > { %v1858_v7 = vpop.eup %1857  ;;  %v1294_v0 = vsub.f32 %v1262_v38, %v2596_v11  ;;  %1385 = vst [vmem:[%s2506_s23 + $0x68] sm:$0xff] %v1353_v61  ;;  %v1355_v9 = vadd.f32 %v1323_v37, %v2568_v60  ;;  %v1137_v36 = vadd.f32 1.0, %v1856_v3  ;;  %1875 = vpow2.f32 %v1592_v53  ;;  %v1017_v35 = vpop.f32.mrb[31].mxu1  ;;  %v1236_v2 = vld [vmem:[%s2180_s19 + $0xc0] sm:$0xff] }
 0x24e   : > { %v1860_v10 = vpop.eup %1859  ;;  %1386 = vst [vmem:[%s2506_s23 + $0x70] sm:$0xff] %v1354_v5  ;;  %1877 = vrcp.f32 %v1136_v20  ;;  %v1138_v57 = vadd.f32 1.0, %v1858_v7  ;;  %v1593_v49 = vmul.f32 -1.442695, %v1012_v1  ;;  %v1016_v44 = vadd.f32 %v1015_v6, %v2418_v54  ;;  %v1237_v6 = vld [vmem:[%s2180_s19 + $0xc8] sm:$0xff] }
 0x24f   : > { %1387 = vst [vmem:[%s2506_s23 + $0x78] sm:$0xff] %v1355_v9  ;;  %1879 = vrcp.f32 %v1137_v36  ;;  %v1139_v13 = vadd.f32 1.0, %v1860_v10  ;;  %v1594_v15 = vmul.f32 -1.442695, %v1014_v47  ;;  %v1018_v16 = vadd.f32 %v1017_v35, %v2420_v55  ;;  %v1912_v7 = vld [vmem:[%s2217_s14 + $0x68] sm:$0xff]  ;;  %v1238_v35 = vld [vmem:[%s2180_s19 + $0xd0] sm:$0xff] }
 0x250   : > { %v1862_v17 = vpop.eup %1861  ;;  %v1295_v60 = vsub.f32 %v1263_v46, %v1231_v8  ;;  %1881 = vrcp.f32 %v1138_v57  ;;  %v1595_v51 = vmul.f32 -1.442695, %v1016_v44  ;;  %v1267_v40 = vunpack.c.h.bf16 %v1910_v30 }
 0x251   : > { %v1864_v21 = vpop.eup %1863  ;;  %v1324_v23 = vmul.f32 %v1862_v17, %v1292_v52  ;;  %1883 = vrcp.f32 %v1139_v13  ;;  %v1596_v54 = vmul.f32 -1.442695, %v1018_v16  ;;  %v1296_v43 = vsub.f32 %v1264_v41, %v1232_v24  ;;  %v1239_v13 = vld [vmem:[%s2180_s19 + $0xd8] sm:$0xff] }
 0x252   : > { %v1866_v14 = vpop.eup %1865  ;;  %v1325_v28 = vmul.f32 %v1864_v21, %v1293_v48  ;;  %1885 = vpow2.f32 %v1593_v49  ;;  %v1297_v22 = vsub.f32 %v1265_v26, %v1233_v18  ;;  %v1299_v48 = vsub.f32 %v1267_v40, %v1235_v63 }
 0x253   : > { %v1868_v55 = vpop.eup %1867  ;;  %v1356_v62 = vadd.f32 %v1324_v23, %v2584_v32  ;;  %v1326_v31 = vmul.f32 %v1866_v14, %v1294_v0  ;;  %1887 = vpow2.f32 %v1594_v15  ;;  %v1268_v61 = vunpack.c.l.bf16 %v1911_v12 }
 0x254   : > { %v1870_v59 = vpop.eup %1869  ;;  %v1357_v34 = vadd.f32 %v1325_v28, %v2589_v19  ;;  %v1327_v38 = vmul.f32 %v1868_v55, %v1295_v60  ;;  %1889 = vpow2.f32 %v1595_v51  ;;  %v1298_v19 = vsub.f32 %v1266_v29, %v1234_v33 }
 0x255   : > { %v1872_v39 = vpop.eup %1871  ;;  %1388 = vst [vmem:[%s2506_s23 + $0x80] sm:$0xff] %v1356_v62  ;;  %v1358_v46 = vadd.f32 %v1326_v31, %v2596_v11  ;;  %v1140_v45 = vadd.f32 1.0, %v1870_v59  ;;  %1891 = vpow2.f32 %v1596_v54  ;;  %v1269_v3 = vunpack.c.h.bf16 %v1911_v12  ;;  %v1241_v31 = vld [vmem:[%s2180_s19 + $0xe8] sm:$0xff]  ;;  %v1914_v59 = vld [vmem:[%s2217_s14 + $0x78] sm:$0xff] }
 0x256   : > { %v1874_v32 = vpop.eup %1873  ;;  %1389 = vst [vmem:[%s2506_s23 + $0x88] sm:$0xff] %v1357_v34  ;;  %v1359_v50 = vadd.f32 %v1327_v38, %v1231_v8  ;;  %v1141_v52 = vadd.f32 1.0, %v1872_v39  ;;  %v1270_v8 = vunpack.c.l.bf16 %v1912_v7  ;;  %v1271_v10 = vunpack.c.h.bf16 %v1912_v7  ;;  %v1242_v38 = vld [vmem:[%s2180_s19 + $0xf0] sm:$0xff] }
 0x257   : > { %v1876_v27 = vpop.eup %1875  ;;  %1390 = vst [vmem:[%s2506_s23 + $0x90] sm:$0xff] %v1358_v46  ;;  %1893 = vrcp.f32 %v1140_v45  ;;  %v1142_v53 = vadd.f32 1.0, %v1874_v32  ;;  %v1300_v15 = vsub.f32 %v1268_v61, %v1236_v2  ;;  %v1301_v51 = vsub.f32 %v1269_v3, %v1237_v6  ;;  %v1243_v46 = vld [vmem:[%s2180_s19 + $0xf8] sm:$0xff] }
 0x258   : > { %v1878_v56 = vpop.eup %1877  ;;  %1391 = vst [vmem:[%s2506_s23 + $0x98] sm:$0xff] %v1359_v50  ;;  %1895 = vrcp.f32 %v1141_v52  ;;  %v1143_v11 = vadd.f32 1.0, %v1876_v27  ;;  %v1302_v25 = vsub.f32 %v1270_v8, %v1238_v35  ;;  %v1303_v54 = vsub.f32 %v1271_v10, %v1239_v13 }
 0x259   : > { %v1880_v4 = vpop.eup %1879  ;;  %v1328_v58 = vmul.f32 %v1878_v56, %v1296_v43  ;;  %1897 = vrcp.f32 %v1142_v53  ;;  %v1275_v39 = vunpack.c.h.bf16 %v1914_v59 }
 0x25a   : > { %v1882_v42 = vpop.eup %1881  ;;  %v1329_v37 = vmul.f32 %v1880_v4, %v1297_v22  ;;  %1899 = vrcp.f32 %v1143_v11 }
 0x25b   : > { %v1884_v1 = vpop.eup %1883  ;;  %v1360_v5 = vadd.f32 %v1328_v58, %v1232_v24  ;;  %v1330_v20 = vmul.f32 %v1882_v42, %v1298_v19  ;;  %v1913_v24 = vld [vmem:[%s2217_s14 + $0x70] sm:$0xff]  ;;  %v1307_v19 = vsub.f32 %v1275_v39, %v1243_v46  ;;  %s1419_s14 = sshll.u32 %s2506_s23, 4  ;;  %s2654_s14 = int_to_ptr.vmem [resolvable:$true] %s1419_s14 }
 0x25c   : > { %v1886_v47 = vpop.eup %1885  ;;  %v1361_v0 = vadd.f32 %v1329_v37, %v1233_v18  ;;  %v1331_v9 = vmul.f32 %v1884_v1, %v1299_v48  ;;  %v1272_v26 = vunpack.c.l.bf16 %v1913_v24  ;;  %v1240_v18 = vld [vmem:[%s2180_s19 + $0xe0] sm:$0xff]  ;;  %v1273_v30 = vunpack.c.h.bf16 %v1913_v24  ;;  %s1607_s19 = sshll.u32 %s2091_s13, 12  ;;  %s1405_s13 = scalar_lea.sflag [#allocation4], %s2174_s29 }
 0x25d   : > { %v1888_v36 = vpop.eup %1887  ;;  %1392 = vst [vmem:[%s2506_s23 + $0xa0] sm:$0xff] %v1360_v5  ;;  %v1362_v57 = vadd.f32 %v1330_v20, %v1234_v33  ;;  %v1144_v49 = vadd.f32 1.0, %v1886_v47  ;;  %v1274_v33 = vunpack.c.l.bf16 %v1914_v59  ;;  %s2652_s20 = scalar_lea.hbm %s2710_s9, %s1607_s19  ;;  %s1945_s24 = scalar_lea.vmem %s2654_s14, 4096 }
 0x25e   : > { %v1890_v44 = vpop.eup %1889  ;;  %1393 = vst [vmem:[%s2506_s23 + $0xa8] sm:$0xff] %v1361_v0  ;;  %v1363_v16 = vadd.f32 %v1331_v9, %v1235_v63  ;;  %v1145_v17 = vadd.f32 1.0, %v1888_v36  ;;  %v1304_v45 = vsub.f32 %v1272_v26, %v1240_v18  ;;  %v1305_v22 = vsub.f32 %v1273_v30, %v1241_v31  ;;  %p1946_p6 = scmp.ne.s32.totalorder %s2654_s14, %s1945_s24  ;;  %p1952_p10 = scmp.lt.s32.totalorder %s2654_s14, %s1950_s28 }
 0x25f   : > { %v1892_v60 = vpop.eup %1891  ;;  %1394 = vst [vmem:[%s2506_s23 + $0xb0] sm:$0xff] %v1362_v57  ;;  %1901 = vrcp.f32 %v1144_v49  ;;  %v1146_v21 = vadd.f32 1.0, %v1890_v44  ;;  %v1306_v52 = vsub.f32 %v1274_v33, %v1242_v38  ;;  %p1953_p0 = scmp.lt.s32.totalorder %s1951_s17, %s1945_s24 }
 0x260   : > { %1395 = vst [vmem:[%s2506_s23 + $0xb8] sm:$0xff] %v1363_v16  ;;  %1903 = vrcp.f32 %v1145_v17  ;;  %v1147_v41 = vadd.f32 1.0, %v1892_v60  ;;  %p1947_p13 = pnand %p1946_p6, %p2722_p12 }
 0x261   : > { %v1894_v23 = vpop.eup %1893  ;;  %1905 = vrcp.f32 %v1146_v21  ;;  %p1954_p2 = por %p1953_p0, %p1952_p10 }
 0x262   : > { %v1896_v14 = vpop.eup %1895  ;;  %v1332_v28 = vmul.f32 %v1894_v23, %v1300_v15  ;;  %1907 = vrcp.f32 %v1147_v41  ;;  %p1948_p8 = pneg %p1947_p13 }
 0x263   : > { %v1898_v55 = vpop.eup %1897  ;;  %v1333_v29 = vmul.f32 %v1896_v14, %v1301_v51 }
 0x264   : > { %v1900_v62 = vpop.eup %1899  ;;  %v1364_v40 = vadd.f32 %v1332_v28, %v1236_v2  ;;  %v1334_v34 = vmul.f32 %v1898_v55, %v1302_v25  ;;  %p1955_p4 = pnand %p1954_p2, %p1948_p8 }
 0x265   : > { %v1365_v63 = vadd.f32 %v1333_v29, %v1237_v6  ;;  %v1335_v43 = vmul.f32 %v1900_v62, %v1303_v54 }
 0x266   : > { %1396 = vst [vmem:[%s2506_s23 + $0xc0] sm:$0xff] %v1364_v40  ;;  %v1366_v32 = vadd.f32 %v1334_v34, %v1238_v35 }
 0x267   : > { %1397 = vst [vmem:[%s2506_s23 + $0xc8] sm:$0xff] %v1365_v63  ;;  %v1367_v50 = vadd.f32 %v1335_v43, %v1239_v13 }
 0x268   : > { %1398 = vst [vmem:[%s2506_s23 + $0xd0] sm:$0xff] %v1366_v32 }
 0x269   : > { %v1902_v27 = vpop.eup %1901  ;;  %1399 = vst [vmem:[%s2506_s23 + $0xd8] sm:$0xff] %v1367_v50 }
 0x26a   : > { %v1904_v53 = vpop.eup %1903  ;;  %v1336_v56 = vmul.f32 %v1902_v27, %v1304_v45 }
 0x26b   : > { %v1906_v48 = vpop.eup %1905  ;;  %v1337_v11 = vmul.f32 %v1904_v53, %v1305_v22 }
 0x26c   : > { %v1908_v4 = vpop.eup %1907  ;;  %v1368_v58 = vadd.f32 %v1336_v56, %v1240_v18  ;;  %v1338_v42 = vmul.f32 %v1906_v48, %v1306_v52 }
 0x26d   : > { %v1369_v12 = vadd.f32 %v1337_v11, %v1241_v31  ;;  %v1339_v61 = vmul.f32 %v1908_v4, %v1307_v19 }
 0x26e   : > { %1400 = vst [vmem:[%s2506_s23 + $0xe0] sm:$0xff] %v1368_v58  ;;  %v1370_v37 = vadd.f32 %v1338_v42, %v1242_v38 }
 0x26f   : > { %1401 = vst [vmem:[%s2506_s23 + $0xe8] sm:$0xff] %v1369_v12  ;;  %v1371_v1 = vadd.f32 %v1339_v61, %v1243_v46 }
 0x270   : > { %1402 = vst [vmem:[%s2506_s23 + $0xf0] sm:$0xff] %v1370_v37 }
 0x271   : > { %1403 = vst [vmem:[%s2506_s23 + $0xf8] sm:$0xff] %v1371_v1 }
 0x272   : > { %1958 = shalt.err (!%p1955_p4)
}
 0x273   : > { %s1959_s27 = scalar_lea.hbm %s2652_s20, 4096  ;;  %s1963_s23 = scalar_lea.hbm %s2710_s9, 8192 }
 0x274   : > { %p1960_p5 = scmp.ne.s32.totalorder %s2652_s20, %s1959_s27  ;;  %p1964_p1 = scmp.lt.u32.totalorder %s2652_s20, %s2710_s9 }
 0x275   : > { %p1965_p3 = scmp.lt.u32.totalorder %s1963_s23, %s1959_s27  ;;  %p1967_p6 = scmp.lt.u32.totalorder %s1959_s27, %s2652_s20 }
 0x276   : > { %p1961_p7 = pnand %p1960_p5, %p2722_p12 }
 0x277   : > { %p1966_p11 = por %p1965_p3, %p1964_p1 }
 0x278   : > { %p1962_p9 = pneg %p1961_p7 }
 0x279   : > { %p1968_p13 = por %p1967_p6, %p1966_p11 }
 0x27b   : > { %p1969_p8 = pnand %p1968_p13, %p1962_p9 }
 0x27d   : > { %1972 = shalt.err (!%p1969_p8)
}
 0x27e   : > { %s2018_s1 = smov 256   ;;  %s2019_s24 = smov 16  }
 0x27f   : > { %1674 = dma.vmem_to_hbm [thread:$0]  (%p2722_p12), %s2654_s14, 4096, %s2652_s20, %s1405_s13, %s2018_s1, %s2018_s1, %s2019_s24  }
 0x280 PF: > { %s1434_s16 = sand.u32 1, %s1999_s30   ;;  %p2723_p10 = scmp.ne.s32.totalorder %s2718_s22, 0 }
 0x281   : > { %p2724_p0 = scmp.ge.s32.totalorder %s2011_s12, 2  ;;  %s1435_s28 = scalar_lea.sflag [#allocation4], %s1434_s16 }
 0x283   : > { %p1681_p2 = pnand %p2724_p0, %p2723_p10 }
 0x285   : > { %1994 = dma.done.wait (!%p1681_p2), %s1435_s28, 4096  }
 0x286   : > { %1996 = vsyncadd (!%p1681_p2), %s1435_s28, 4294963200  ;;  %s2725_s17 = sld [smem:[#allocation8_spill]]  ;;  %p22_p4 = scmp.ge.s32.totalorder %s2095_s15, 4  }
 0x287   : > { %s2726_s30 = smov %s2003_s10  ;;  %s2727_s10 = smov %s2007_s11 }
 0x288   : > { %s2729_s12 = smov %s2095_s15  ;;  %24 = sbr.rel (!%p22_p4) target bundleno = 7 (0x7), region = 104 }
 0x28c   : > { %s2728_s11 = smov %s2725_s17 }
 0x28f   :  { %1440 = vsyncpa [#allocation3], 1 }
 0x290   :  { %1442 = vsyncpa [#allocation3 + $0x1], 1 }
 0x291   :  { %1443 = vsyncpa [#allocation4], 1 }
 0x292   :  { %1445 = vsyncpa [#allocation4 + $0x1], 1 }

</bundles_post_ra>
